<compile_context>
chip_gen: v7x
topology: tpu7x:2x2x1
jax: 0.10.0
libtpu: 0.0.40
codegen_flags: <defaults>
</compile_context>

<pallas_src>
import math
import functools

import jax
import jax.numpy as jnp
from jax.experimental import pallas as pl
from jax.experimental.pallas import tpu as pltpu


# ----------------------------- Pallas kernels ------------------------------ #

def _qkv_attention_kernel(xq_ref, xkv_ref, wq_ref, wk_ref, wv_ref, segb_ref,
                          y_ref, *, num_heads, head_dim, scale, compute_dtype):
    """Fused (folded) q/k/v projections + segmented multi-head attention.

    One grid step = one batch element.  Produces y with natural token order
    and head-major channels: y[t, h*d + j] = attn_out[h, seg(t), pos(t), j].
    """
    f32 = jnp.float32
    cd = compute_dtype
    N = xq_ref.shape[0]
    C = num_heads * head_dim

    xq = xq_ref[...].astype(cd)                                    # (N, dim)
    xkv = xkv_ref[...].astype(cd)                                  # (N, dim)

    # Folded projections: q = x_query @ (reduce^T W_q^T), etc.
    q = jnp.dot(xq, wq_ref[...].astype(cd), preferred_element_type=f32)   # (N, C)
    k = jnp.dot(xkv, wk_ref[...].astype(cd), preferred_element_type=f32)  # (N, C)
    v = jnp.dot(xkv, wv_ref[...].astype(cd), preferred_element_type=f32)  # (N, C)

    seg_bias = segb_ref[...]                                       # (N, N), 0 / -1e30
    chan = jax.lax.broadcasted_iota(jnp.int32, (1, C), 1)          # (1, C)
    kc = k.astype(cd)

    y = jnp.zeros((N, C), dtype=f32)
    for h in range(num_heads):                                     # static unroll
        lo = h * head_dim
        hi = lo + head_dim
        # Exact-zero channel mask: masked channels contribute 0 to the
        # contraction, so results equal per-head slicing (in any dtype).
        head_mask = ((chan >= lo) & (chan < hi)).astype(f32)       # (1, C)
        qh = (q * head_mask).astype(cd)

        # Q @ K^T via dot_general contracting the channel axis of BOTH
        # operands -> no transpose materialized.
        scores = jax.lax.dot_general(
            qh, kc, dimension_numbers=(((1,), (1,)), ((), ())),
            preferred_element_type=f32)                            # (N, N)
        scores = scores * scale + seg_bias
        scores = scores - jnp.max(scores, axis=-1, keepdims=True)
        p = jnp.exp(scores)
        p = p * pl.reciprocal(jnp.sum(p, axis=-1, keepdims=True), approx=True)

        vh = (v * head_mask).astype(cd)                            # zeros outside head h
        # Places head h's output in its own channel block; other columns are 0.
        y = y + jnp.dot(p.astype(cd), vh, preferred_element_type=f32)

    y_ref[...] = y.astype(y_ref.dtype)                             # lane-dense (N, C) store


def _proj_bias_kernel(x_ref, w_ref, b_ref, o_ref, *, compute_dtype):
    """out = x @ w + b on one row-tile (weights stay VMEM-resident)."""
    cd = compute_dtype
    acc = jnp.dot(x_ref[...].astype(cd), w_ref[...].astype(cd),
                  preferred_element_type=jnp.float32)
    o_ref[...] = (acc + b_ref[...].astype(jnp.float32)).astype(o_ref.dtype)


# ------------------------------ Pallas wrapper ------------------------------ #

def efficient_cross_attention(x_query, x_kv, params, *, num_heads, split_segment,
                              compute_dtype=jnp.float32):
    B, N, dim = x_kv.shape
    assert x_query.shape == (B, N, dim), "query and kv must share (B, N, dim)"
    C = dim // 2
    H = num_heads
    d = C // H
    sseg = split_segment
    # TODO(synk): torch uses ceil-style segmenting; only N % split_segment == 0 supported.
    assert N % sseg == 0
    n = N // sseg
    # Torch quirk: scale uses the FULL-dim head size (dim // num_heads), not d.
    scale = float((dim // num_heads) ** (-0.5))

    hi = jax.lax.Precision.HIGHEST
    # Fold reduce into q/k/v: q = x @ reduce^T @ W_q^T = x @ wq_f, etc. (exact).
    wq_f = jnp.matmul(params["reduce_w"].T, params["wq"].T, precision=hi)  # (dim, C)
    wk_f = jnp.matmul(params["reduce_w"].T, params["wk"].T, precision=hi)  # (dim, C)
    wv_f = jnp.matmul(params["reduce_w"].T, params["wv"].T, precision=hi)  # (dim, C)
    proj_wt = params["proj_w"].T                                           # (C, dim)
    proj_b = params["proj_b"].reshape(1, dim)

    # Block-diagonal segment bias (token i attends only within its segment).
    tok = jnp.arange(N, dtype=jnp.int32)
    same_seg = (tok[:, None] // n) == (tok[None, :] // n)
    seg_bias = jnp.where(same_seg, 0.0, -1e30).astype(jnp.float32)         # (N, N)

    attn_kernel = functools.partial(
        _qkv_attention_kernel, num_heads=H, head_dim=d, scale=scale,
        compute_dtype=compute_dtype)

    # ---- pallas_call #1: fused projections + attention (grid over batch) ----
    y = pl.pallas_call(
        attn_kernel,
        grid=(B,),
        in_specs=[
            pl.BlockSpec((None, N, dim), lambda b: (b, 0, 0)),   # x_query
            pl.BlockSpec((None, N, dim), lambda b: (b, 0, 0)),   # x_kv
            pl.BlockSpec((dim, C), lambda b: (0, 0)),            # wq_f  (VMEM-resident)
            pl.BlockSpec((dim, C), lambda b: (0, 0)),            # wk_f
            pl.BlockSpec((dim, C), lambda b: (0, 0)),            # wv_f
            pl.BlockSpec((N, N), lambda b: (0, 0)),              # segment bias
        ],
        out_specs=pl.BlockSpec((None, N, C), lambda b: (b, 0, 0)),
        out_shape=jax.ShapeDtypeStruct((B, N, C), x_query.dtype),
        compiler_params=pltpu.CompilerParams(
            dimension_semantics=("parallel",)),                  # v7x megacore
    )(x_query, x_kv, wq_f, wk_f, wv_f, seg_bias)

    # Reproduce torch's (attn @ v).transpose(1,2) -> cat(dim=1) -> reshape(B,N,C)
    # element scramble: (b, sg, i, h, j) -> flat order (sg, h, b, i, j).
    # One tiny (16 KB here) XLA transpose; this IS the module's own data motion.
    y_scr = (y.reshape(B, sseg, n, H, d)
              .transpose(1, 3, 0, 2, 4)
              .reshape(B * N, C))

    # ---- pallas_call #2: proj(+bias), tiled over rows (lane-dense I/O) ----
    M = B * N
    tm = M if M <= 512 else 512
    proj_kernel = functools.partial(_proj_bias_kernel, compute_dtype=compute_dtype)
    out2d = pl.pallas_call(
        proj_kernel,
        grid=(pl.cdiv(M, tm),),
        in_specs=[
            pl.BlockSpec((tm, C), lambda i: (i, 0)),
            pl.BlockSpec((C, dim), lambda i: (0, 0)),            # weight stays resident
            pl.BlockSpec((1, dim), lambda i: (0, 0)),
        ],
        out_specs=pl.BlockSpec((tm, dim), lambda i: (i, 0)),
        out_shape=jax.ShapeDtypeStruct((M, dim), x_query.dtype),
        compiler_params=pltpu.CompilerParams(
            dimension_semantics=("parallel",)),
    )(y_scr, proj_wt, proj_b)

    return out2d.reshape(B, N, dim)


# --------------------- pure-JAX reference (mirrors torch) ------------------- #

def _reference_forward(x_query, x_kv, params, *, num_heads, split_segment):
    with jax.default_matmul_precision("highest"):
        B, N, dim = x_kv.shape
        C = dim // 2
        H = num_heads
        d = C // H
        s = split_segment
        n = N // s
        scale = (dim // num_heads) ** (-0.5)
        xq = x_query @ params["reduce_w"].T
        xkv = x_kv @ params["reduce_w"].T
        q = (xq @ params["wq"].T).reshape(B, N, 1, H, d).transpose(2, 0, 3, 1, 4)  # (1,B,H,N,d)
        k = (xkv @ params["wk"].T).reshape(B, N, H, d).transpose(0, 2, 1, 3)       # (B,H,N,d)
        v = (xkv @ params["wv"].T).reshape(B, N, H, d).transpose(0, 2, 1, 3)
        outs = []
        for sg in range(s):
            qs = q[..., sg * n:(sg + 1) * n, :]
            ks = k[..., sg * n:(sg + 1) * n, :]
            vs = v[..., sg * n:(sg + 1) * n, :]
            attn = jnp.einsum("ubhnd,bhmd->ubhnm", qs, ks) * scale
            attn = jax.nn.softmax(attn, axis=-1)
            o = jnp.einsum("ubhnm,bhmd->ubhnd", attn, vs)          # (1,B,H,n,d)
            outs.append(jnp.swapaxes(o, 1, 2))                     # torch .transpose(1,2)
        x = jnp.concatenate(outs, axis=1).reshape(B, N, C)         # torch cat+reshape scramble
        return x @ params["proj_w"].T + params["proj_b"]


# ---------------------------------- main ----------------------------------- #

if __name__ == "__main__":
    B, N, dim = 2, 32, 128
    num_heads, split_segment = 8, 4
    C = dim // 2

    key = jax.random.PRNGKey(0)
    ks = jax.random.split(key, 8)

    x_query = jax.random.normal(ks[0], (B, N, dim), jnp.float32)
    x_kv = jax.random.normal(ks[1], (B, N, dim), jnp.float32)

    def init_w(k, out_f, in_f):
        bound = 1.0 / math.sqrt(in_f)
        return jax.random.uniform(k, (out_f, in_f), jnp.float32, -bound, bound)

    params = {
        "reduce_w": init_w(ks[2], C, dim),   # nn.Linear(dim, dim//2, bias=False)
        "wq": init_w(ks[3], C, C),           # nn.Linear(dim//2, dim//2, bias=False)
        "wk": init_w(ks[4], C, C),
        "wv": init_w(ks[5], C, C),
        "proj_w": init_w(ks[6], dim, C),     # nn.Linear(dim//2, dim)
        "proj_b": jax.random.uniform(
            ks[7], (dim,), jnp.float32, -1.0 / math.sqrt(C), 1.0 / math.sqrt(C)),
    }

    fn = jax.jit(functools.partial(
        efficient_cross_attention, num_heads=num_heads, split_segment=split_segment))
    out = jax.block_until_ready(fn(x_query, x_kv, params))

    assert out.shape == (B, N, dim), out.shape
    assert bool(jnp.all(jnp.isfinite(out)))

    ref = _reference_forward(x_query, x_kv, params,
                             num_heads=num_heads, split_segment=split_segment)
    assert bool(jnp.allclose(out, ref, atol=2e-2, rtol=2e-2)), (
        float(jnp.max(jnp.abs(out - ref))))

    print("KERNEL_OK")
</pallas_src>

<mosaic_0001>
module attributes {stable_mosaic.version = 11 : i64} {
  func.func @_qkv_attention_kernel(%arg0: i32, %arg1: memref<1x32x128xf32, #tpu.memory_space<vmem>>, %arg2: memref<1x32x128xf32, #tpu.memory_space<vmem>>, %arg3: memref<128x64xf32, #tpu.memory_space<vmem>>, %arg4: memref<128x64xf32, #tpu.memory_space<vmem>>, %arg5: memref<128x64xf32, #tpu.memory_space<vmem>>, %arg6: memref<32x32xf32, #tpu.memory_space<vmem>>, %arg7: memref<1x32x64xf32, #tpu.memory_space<vmem>>) attributes {dimension_semantics = [#tpu.dimension_semantics<parallel>], iteration_bounds = array<i64: 2>, scalar_prefetch = 0 : i64, scratch_operands = 0 : i64, tpu.core_type = #tpu.core_type<tc>, window_params = [{transform_indices = @transform_0, window_bounds = array<i64: 1, 32, 128>}, {transform_indices = @transform_1, window_bounds = array<i64: 1, 32, 128>}, {pipeline_mode = #tpu.pipeline_mode<synchronous>, transform_indices = @transform_2, window_bounds = array<i64: 128, 64>}, {pipeline_mode = #tpu.pipeline_mode<synchronous>, transform_indices = @transform_3, window_bounds = array<i64: 128, 64>}, {pipeline_mode = #tpu.pipeline_mode<synchronous>, transform_indices = @transform_4, window_bounds = array<i64: 128, 64>}, {pipeline_mode = #tpu.pipeline_mode<synchronous>, transform_indices = @transform_5, window_bounds = array<i64: 32, 32>}, {transform_indices = @transform_6, window_bounds = array<i64: 1, 32, 64>}]} {
    %c0 = arith.constant 0 : index
    %c0_0 = arith.constant 0 : index
    %c0_1 = arith.constant 0 : index
    %0 = vector.load %arg1[%c0, %c0_0, %c0_1] : memref<1x32x128xf32, #tpu.memory_space<vmem>>, vector<1x32x128xf32>
    %1 = vector.shape_cast %0 : vector<1x32x128xf32> to vector<32x128xf32>
    %c0_2 = arith.constant 0 : index
    %c0_3 = arith.constant 0 : index
    %c0_4 = arith.constant 0 : index
    %2 = vector.load %arg2[%c0_2, %c0_3, %c0_4] : memref<1x32x128xf32, #tpu.memory_space<vmem>>, vector<1x32x128xf32>
    %3 = vector.shape_cast %2 : vector<1x32x128xf32> to vector<32x128xf32>
    %c0_5 = arith.constant 0 : index
    %c0_6 = arith.constant 0 : index
    %4 = vector.load %arg3[%c0_5, %c0_6] : memref<128x64xf32, #tpu.memory_space<vmem>>, vector<128x64xf32>
    %cst = arith.constant dense<0.000000e+00> : vector<32x64xf32>
    %5 = tpu.matmul %1, %4, %cst {dimension_numbers = #tpu.dot_dimension_numbers<[1], [0], [0], [1], [0, 0, 1, 1], [], []>} : vector<32x128xf32>, vector<128x64xf32>, vector<32x64xf32> -> vector<32x64xf32>
    %c0_7 = arith.constant 0 : index
    %c0_8 = arith.constant 0 : index
    %6 = vector.load %arg4[%c0_7, %c0_8] : memref<128x64xf32, #tpu.memory_space<vmem>>, vector<128x64xf32>
    %cst_9 = arith.constant dense<0.000000e+00> : vector<32x64xf32>
    %7 = tpu.matmul %3, %6, %cst_9 {dimension_numbers = #tpu.dot_dimension_numbers<[1], [0], [0], [1], [0, 0, 1, 1], [], []>} : vector<32x128xf32>, vector<128x64xf32>, vector<32x64xf32> -> vector<32x64xf32>
    %c0_10 = arith.constant 0 : index
    %c0_11 = arith.constant 0 : index
    %8 = vector.load %arg5[%c0_10, %c0_11] : memref<128x64xf32, #tpu.memory_space<vmem>>, vector<128x64xf32>
    %cst_12 = arith.constant dense<0.000000e+00> : vector<32x64xf32>
    %9 = tpu.matmul %3, %8, %cst_12 {dimension_numbers = #tpu.dot_dimension_numbers<[1], [0], [0], [1], [0, 0, 1, 1], [], []>} : vector<32x128xf32>, vector<128x64xf32>, vector<32x64xf32> -> vector<32x64xf32>
    %c0_13 = arith.constant 0 : index
    %c0_14 = arith.constant 0 : index
    %10 = vector.load %arg6[%c0_13, %c0_14] : memref<32x32xf32, #tpu.memory_space<vmem>>, vector<32x32xf32>
    %11 = tpu.iota {dimensions = array<i32: 1>} : vector<1x64xi32>
    %cst_15 = arith.constant 0.000000e+00 : f32
    %12 = vector.broadcast %cst_15 : f32 to vector<32x64xf32>
    %c0_i32 = arith.constant 0 : i32
    %13 = vector.broadcast %c0_i32 : i32 to vector<1x64xi32>
    %14 = arith.cmpi sge, %11, %13 : vector<1x64xi32>
    %c8_i32 = arith.constant 8 : i32
    %15 = vector.broadcast %c8_i32 : i32 to vector<1x64xi32>
    %16 = arith.cmpi slt, %11, %15 : vector<1x64xi32>
    %17 = arith.andi %14, %16 : vector<1x64xi1>
    %18 = arith.extui %17 : vector<1x64xi1> to vector<1x64xi32>
    %19 = arith.sitofp %18 : vector<1x64xi32> to vector<1x64xf32>
    %20 = vector.broadcast %19 : vector<1x64xf32> to vector<32x64xf32>
    %21 = arith.mulf %5, %20 : vector<32x64xf32>
    %cst_16 = arith.constant dense<0.000000e+00> : vector<32x32xf32>
    %22 = tpu.matmul %21, %7, %cst_16 {dimension_numbers = #tpu.dot_dimension_numbers<[1], [1], [0], [0], [0, 0, 1, 0], [], []>} : vector<32x64xf32>, vector<32x64xf32>, vector<32x32xf32> -> vector<32x32xf32>
    %cst_17 = arith.constant 2.500000e-01 : f32
    %23 = vector.broadcast %cst_17 : f32 to vector<32x32xf32>
    %24 = arith.mulf %22, %23 : vector<32x32xf32>
    %25 = arith.addf %24, %10 : vector<32x32xf32>
    %cst_18 = arith.constant dense<0xFF800000> : vector<32xf32>
    %26 = vector.multi_reduction <maximumf>, %25, %cst_18 [1] : vector<32x32xf32> to vector<32xf32>
    %27 = vector.shape_cast %26 : vector<32xf32> to vector<32x1xf32>
    %28 = vector.broadcast %27 : vector<32x1xf32> to vector<32x32xf32>
    %29 = arith.subf %25, %28 : vector<32x32xf32>
    %30 = math.exp %29 : vector<32x32xf32>
    %cst_19 = arith.constant dense<0.000000e+00> : vector<32xf32>
    %31 = vector.multi_reduction <add>, %30, %cst_19 [1] : vector<32x32xf32> to vector<32xf32>
    %32 = vector.shape_cast %31 : vector<32xf32> to vector<32x1xf32>
    %33 = tpu.reciprocal %32 {approx = true} : vector<32x1xf32> -> vector<32x1xf32>
    %34 = vector.broadcast %33 : vector<32x1xf32> to vector<32x32xf32>
    %35 = arith.mulf %30, %34 : vector<32x32xf32>
    %36 = vector.broadcast %19 : vector<1x64xf32> to vector<32x64xf32>
    %37 = arith.mulf %9, %36 : vector<32x64xf32>
    %cst_20 = arith.constant dense<0.000000e+00> : vector<32x64xf32>
    %38 = tpu.matmul %35, %37, %cst_20 {dimension_numbers = #tpu.dot_dimension_numbers<[1], [0], [0], [1], [0, 0, 1, 1], [], []>} : vector<32x32xf32>, vector<32x64xf32>, vector<32x64xf32> -> vector<32x64xf32>
    %39 = arith.addf %12, %38 : vector<32x64xf32>
    %c8_i32_21 = arith.constant 8 : i32
    %40 = vector.broadcast %c8_i32_21 : i32 to vector<1x64xi32>
    %41 = arith.cmpi sge, %11, %40 : vector<1x64xi32>
    %c16_i32 = arith.constant 16 : i32
    %42 = vector.broadcast %c16_i32 : i32 to vector<1x64xi32>
    %43 = arith.cmpi slt, %11, %42 : vector<1x64xi32>
    %44 = arith.andi %41, %43 : vector<1x64xi1>
    %45 = arith.extui %44 : vector<1x64xi1> to vector<1x64xi32>
    %46 = arith.sitofp %45 : vector<1x64xi32> to vector<1x64xf32>
    %47 = vector.broadcast %46 : vector<1x64xf32> to vector<32x64xf32>
    %48 = arith.mulf %5, %47 : vector<32x64xf32>
    %cst_22 = arith.constant dense<0.000000e+00> : vector<32x32xf32>
    %49 = tpu.matmul %48, %7, %cst_22 {dimension_numbers = #tpu.dot_dimension_numbers<[1], [1], [0], [0], [0, 0, 1, 0], [], []>} : vector<32x64xf32>, vector<32x64xf32>, vector<32x32xf32> -> vector<32x32xf32>
    %cst_23 = arith.constant 2.500000e-01 : f32
    %50 = vector.broadcast %cst_23 : f32 to vector<32x32xf32>
    %51 = arith.mulf %49, %50 : vector<32x32xf32>
    %52 = arith.addf %51, %10 : vector<32x32xf32>
    %cst_24 = arith.constant dense<0xFF800000> : vector<32xf32>
    %53 = vector.multi_reduction <maximumf>, %52, %cst_24 [1] : vector<32x32xf32> to vector<32xf32>
    %54 = vector.shape_cast %53 : vector<32xf32> to vector<32x1xf32>
    %55 = vector.broadcast %54 : vector<32x1xf32> to vector<32x32xf32>
    %56 = arith.subf %52, %55 : vector<32x32xf32>
    %57 = math.exp %56 : vector<32x32xf32>
    %cst_25 = arith.constant dense<0.000000e+00> : vector<32xf32>
    %58 = vector.multi_reduction <add>, %57, %cst_25 [1] : vector<32x32xf32> to vector<32xf32>
    %59 = vector.shape_cast %58 : vector<32xf32> to vector<32x1xf32>
    %60 = tpu.reciprocal %59 {approx = true} : vector<32x1xf32> -> vector<32x1xf32>
    %61 = vector.broadcast %60 : vector<32x1xf32> to vector<32x32xf32>
    %62 = arith.mulf %57, %61 : vector<32x32xf32>
    %63 = vector.broadcast %46 : vector<1x64xf32> to vector<32x64xf32>
    %64 = arith.mulf %9, %63 : vector<32x64xf32>
    %cst_26 = arith.constant dense<0.000000e+00> : vector<32x64xf32>
    %65 = tpu.matmul %62, %64, %cst_26 {dimension_numbers = #tpu.dot_dimension_numbers<[1], [0], [0], [1], [0, 0, 1, 1], [], []>} : vector<32x32xf32>, vector<32x64xf32>, vector<32x64xf32> -> vector<32x64xf32>
    %66 = arith.addf %39, %65 : vector<32x64xf32>
    %c16_i32_27 = arith.constant 16 : i32
    %67 = vector.broadcast %c16_i32_27 : i32 to vector<1x64xi32>
    %68 = arith.cmpi sge, %11, %67 : vector<1x64xi32>
    %c24_i32 = arith.constant 24 : i32
    %69 = vector.broadcast %c24_i32 : i32 to vector<1x64xi32>
    %70 = arith.cmpi slt, %11, %69 : vector<1x64xi32>
    %71 = arith.andi %68, %70 : vector<1x64xi1>
    %72 = arith.extui %71 : vector<1x64xi1> to vector<1x64xi32>
    %73 = arith.sitofp %72 : vector<1x64xi32> to vector<1x64xf32>
    %74 = vector.broadcast %73 : vector<1x64xf32> to vector<32x64xf32>
    %75 = arith.mulf %5, %74 : vector<32x64xf32>
    %cst_28 = arith.constant dense<0.000000e+00> : vector<32x32xf32>
    %76 = tpu.matmul %75, %7, %cst_28 {dimension_numbers = #tpu.dot_dimension_numbers<[1], [1], [0], [0], [0, 0, 1, 0], [], []>} : vector<32x64xf32>, vector<32x64xf32>, vector<32x32xf32> -> vector<32x32xf32>
    %cst_29 = arith.constant 2.500000e-01 : f32
    %77 = vector.broadcast %cst_29 : f32 to vector<32x32xf32>
    %78 = arith.mulf %76, %77 : vector<32x32xf32>
    %79 = arith.addf %78, %10 : vector<32x32xf32>
    %cst_30 = arith.constant dense<0xFF800000> : vector<32xf32>
    %80 = vector.multi_reduction <maximumf>, %79, %cst_30 [1] : vector<32x32xf32> to vector<32xf32>
    %81 = vector.shape_cast %80 : vector<32xf32> to vector<32x1xf32>
    %82 = vector.broadcast %81 : vector<32x1xf32> to vector<32x32xf32>
    %83 = arith.subf %79, %82 : vector<32x32xf32>
    %84 = math.exp %83 : vector<32x32xf32>
    %cst_31 = arith.constant dense<0.000000e+00> : vector<32xf32>
    %85 = vector.multi_reduction <add>, %84, %cst_31 [1] : vector<32x32xf32> to vector<32xf32>
    %86 = vector.shape_cast %85 : vector<32xf32> to vector<32x1xf32>
    %87 = tpu.reciprocal %86 {approx = true} : vector<32x1xf32> -> vector<32x1xf32>
    %88 = vector.broadcast %87 : vector<32x1xf32> to vector<32x32xf32>
    %89 = arith.mulf %84, %88 : vector<32x32xf32>
    %90 = vector.broadcast %73 : vector<1x64xf32> to vector<32x64xf32>
    %91 = arith.mulf %9, %90 : vector<32x64xf32>
    %cst_32 = arith.constant dense<0.000000e+00> : vector<32x64xf32>
    %92 = tpu.matmul %89, %91, %cst_32 {dimension_numbers = #tpu.dot_dimension_numbers<[1], [0], [0], [1], [0, 0, 1, 1], [], []>} : vector<32x32xf32>, vector<32x64xf32>, vector<32x64xf32> -> vector<32x64xf32>
    %93 = arith.addf %66, %92 : vector<32x64xf32>
    %c24_i32_33 = arith.constant 24 : i32
    %94 = vector.broadcast %c24_i32_33 : i32 to vector<1x64xi32>
    %95 = arith.cmpi sge, %11, %94 : vector<1x64xi32>
    %c32_i32 = arith.constant 32 : i32
    %96 = vector.broadcast %c32_i32 : i32 to vector<1x64xi32>
    %97 = arith.cmpi slt, %11, %96 : vector<1x64xi32>
    %98 = arith.andi %95, %97 : vector<1x64xi1>
    %99 = arith.extui %98 : vector<1x64xi1> to vector<1x64xi32>
    %100 = arith.sitofp %99 : vector<1x64xi32> to vector<1x64xf32>
    %101 = vector.broadcast %100 : vector<1x64xf32> to vector<32x64xf32>
    %102 = arith.mulf %5, %101 : vector<32x64xf32>
    %cst_34 = arith.constant dense<0.000000e+00> : vector<32x32xf32>
    %103 = tpu.matmul %102, %7, %cst_34 {dimension_numbers = #tpu.dot_dimension_numbers<[1], [1], [0], [0], [0, 0, 1, 0], [], []>} : vector<32x64xf32>, vector<32x64xf32>, vector<32x32xf32> -> vector<32x32xf32>
    %cst_35 = arith.constant 2.500000e-01 : f32
    %104 = vector.broadcast %cst_35 : f32 to vector<32x32xf32>
    %105 = arith.mulf %103, %104 : vector<32x32xf32>
    %106 = arith.addf %105, %10 : vector<32x32xf32>
    %cst_36 = arith.constant dense<0xFF800000> : vector<32xf32>
    %107 = vector.multi_reduction <maximumf>, %106, %cst_36 [1] : vector<32x32xf32> to vector<32xf32>
    %108 = vector.shape_cast %107 : vector<32xf32> to vector<32x1xf32>
    %109 = vector.broadcast %108 : vector<32x1xf32> to vector<32x32xf32>
    %110 = arith.subf %106, %109 : vector<32x32xf32>
    %111 = math.exp %110 : vector<32x32xf32>
    %cst_37 = arith.constant dense<0.000000e+00> : vector<32xf32>
    %112 = vector.multi_reduction <add>, %111, %cst_37 [1] : vector<32x32xf32> to vector<32xf32>
    %113 = vector.shape_cast %112 : vector<32xf32> to vector<32x1xf32>
    %114 = tpu.reciprocal %113 {approx = true} : vector<32x1xf32> -> vector<32x1xf32>
    %115 = vector.broadcast %114 : vector<32x1xf32> to vector<32x32xf32>
    %116 = arith.mulf %111, %115 : vector<32x32xf32>
    %117 = vector.broadcast %100 : vector<1x64xf32> to vector<32x64xf32>
    %118 = arith.mulf %9, %117 : vector<32x64xf32>
    %cst_38 = arith.constant dense<0.000000e+00> : vector<32x64xf32>
    %119 = tpu.matmul %116, %118, %cst_38 {dimension_numbers = #tpu.dot_dimension_numbers<[1], [0], [0], [1], [0, 0, 1, 1], [], []>} : vector<32x32xf32>, vector<32x64xf32>, vector<32x64xf32> -> vector<32x64xf32>
    %120 = arith.addf %93, %119 : vector<32x64xf32>
    %c32_i32_39 = arith.constant 32 : i32
    %121 = vector.broadcast %c32_i32_39 : i32 to vector<1x64xi32>
    %122 = arith.cmpi sge, %11, %121 : vector<1x64xi32>
    %c40_i32 = arith.constant 40 : i32
    %123 = vector.broadcast %c40_i32 : i32 to vector<1x64xi32>
    %124 = arith.cmpi slt, %11, %123 : vector<1x64xi32>
    %125 = arith.andi %122, %124 : vector<1x64xi1>
    %126 = arith.extui %125 : vector<1x64xi1> to vector<1x64xi32>
    %127 = arith.sitofp %126 : vector<1x64xi32> to vector<1x64xf32>
    %128 = vector.broadcast %127 : vector<1x64xf32> to vector<32x64xf32>
    %129 = arith.mulf %5, %128 : vector<32x64xf32>
    %cst_40 = arith.constant dense<0.000000e+00> : vector<32x32xf32>
    %130 = tpu.matmul %129, %7, %cst_40 {dimension_numbers = #tpu.dot_dimension_numbers<[1], [1], [0], [0], [0, 0, 1, 0], [], []>} : vector<32x64xf32>, vector<32x64xf32>, vector<32x32xf32> -> vector<32x32xf32>
    %cst_41 = arith.constant 2.500000e-01 : f32
    %131 = vector.broadcast %cst_41 : f32 to vector<32x32xf32>
    %132 = arith.mulf %130, %131 : vector<32x32xf32>
    %133 = arith.addf %132, %10 : vector<32x32xf32>
    %cst_42 = arith.constant dense<0xFF800000> : vector<32xf32>
    %134 = vector.multi_reduction <maximumf>, %133, %cst_42 [1] : vector<32x32xf32> to vector<32xf32>
    %135 = vector.shape_cast %134 : vector<32xf32> to vector<32x1xf32>
    %136 = vector.broadcast %135 : vector<32x1xf32> to vector<32x32xf32>
    %137 = arith.subf %133, %136 : vector<32x32xf32>
    %138 = math.exp %137 : vector<32x32xf32>
    %cst_43 = arith.constant dense<0.000000e+00> : vector<32xf32>
    %139 = vector.multi_reduction <add>, %138, %cst_43 [1] : vector<32x32xf32> to vector<32xf32>
    %140 = vector.shape_cast %139 : vector<32xf32> to vector<32x1xf32>
    %141 = tpu.reciprocal %140 {approx = true} : vector<32x1xf32> -> vector<32x1xf32>
    %142 = vector.broadcast %141 : vector<32x1xf32> to vector<32x32xf32>
    %143 = arith.mulf %138, %142 : vector<32x32xf32>
    %144 = vector.broadcast %127 : vector<1x64xf32> to vector<32x64xf32>
    %145 = arith.mulf %9, %144 : vector<32x64xf32>
    %cst_44 = arith.constant dense<0.000000e+00> : vector<32x64xf32>
    %146 = tpu.matmul %143, %145, %cst_44 {dimension_numbers = #tpu.dot_dimension_numbers<[1], [0], [0], [1], [0, 0, 1, 1], [], []>} : vector<32x32xf32>, vector<32x64xf32>, vector<32x64xf32> -> vector<32x64xf32>
    %147 = arith.addf %120, %146 : vector<32x64xf32>
    %c40_i32_45 = arith.constant 40 : i32
    %148 = vector.broadcast %c40_i32_45 : i32 to vector<1x64xi32>
    %149 = arith.cmpi sge, %11, %148 : vector<1x64xi32>
    %c48_i32 = arith.constant 48 : i32
    %150 = vector.broadcast %c48_i32 : i32 to vector<1x64xi32>
    %151 = arith.cmpi slt, %11, %150 : vector<1x64xi32>
    %152 = arith.andi %149, %151 : vector<1x64xi1>
    %153 = arith.extui %152 : vector<1x64xi1> to vector<1x64xi32>
    %154 = arith.sitofp %153 : vector<1x64xi32> to vector<1x64xf32>
    %155 = vector.broadcast %154 : vector<1x64xf32> to vector<32x64xf32>
    %156 = arith.mulf %5, %155 : vector<32x64xf32>
    %cst_46 = arith.constant dense<0.000000e+00> : vector<32x32xf32>
    %157 = tpu.matmul %156, %7, %cst_46 {dimension_numbers = #tpu.dot_dimension_numbers<[1], [1], [0], [0], [0, 0, 1, 0], [], []>} : vector<32x64xf32>, vector<32x64xf32>, vector<32x32xf32> -> vector<32x32xf32>
    %cst_47 = arith.constant 2.500000e-01 : f32
    %158 = vector.broadcast %cst_47 : f32 to vector<32x32xf32>
    %159 = arith.mulf %157, %158 : vector<32x32xf32>
    %160 = arith.addf %159, %10 : vector<32x32xf32>
    %cst_48 = arith.constant dense<0xFF800000> : vector<32xf32>
    %161 = vector.multi_reduction <maximumf>, %160, %cst_48 [1] : vector<32x32xf32> to vector<32xf32>
    %162 = vector.shape_cast %161 : vector<32xf32> to vector<32x1xf32>
    %163 = vector.broadcast %162 : vector<32x1xf32> to vector<32x32xf32>
    %164 = arith.subf %160, %163 : vector<32x32xf32>
    %165 = math.exp %164 : vector<32x32xf32>
    %cst_49 = arith.constant dense<0.000000e+00> : vector<32xf32>
    %166 = vector.multi_reduction <add>, %165, %cst_49 [1] : vector<32x32xf32> to vector<32xf32>
    %167 = vector.shape_cast %166 : vector<32xf32> to vector<32x1xf32>
    %168 = tpu.reciprocal %167 {approx = true} : vector<32x1xf32> -> vector<32x1xf32>
    %169 = vector.broadcast %168 : vector<32x1xf32> to vector<32x32xf32>
    %170 = arith.mulf %165, %169 : vector<32x32xf32>
    %171 = vector.broadcast %154 : vector<1x64xf32> to vector<32x64xf32>
    %172 = arith.mulf %9, %171 : vector<32x64xf32>
    %cst_50 = arith.constant dense<0.000000e+00> : vector<32x64xf32>
    %173 = tpu.matmul %170, %172, %cst_50 {dimension_numbers = #tpu.dot_dimension_numbers<[1], [0], [0], [1], [0, 0, 1, 1], [], []>} : vector<32x32xf32>, vector<32x64xf32>, vector<32x64xf32> -> vector<32x64xf32>
    %174 = arith.addf %147, %173 : vector<32x64xf32>
    %c48_i32_51 = arith.constant 48 : i32
    %175 = vector.broadcast %c48_i32_51 : i32 to vector<1x64xi32>
    %176 = arith.cmpi sge, %11, %175 : vector<1x64xi32>
    %c56_i32 = arith.constant 56 : i32
    %177 = vector.broadcast %c56_i32 : i32 to vector<1x64xi32>
    %178 = arith.cmpi slt, %11, %177 : vector<1x64xi32>
    %179 = arith.andi %176, %178 : vector<1x64xi1>
    %180 = arith.extui %179 : vector<1x64xi1> to vector<1x64xi32>
    %181 = arith.sitofp %180 : vector<1x64xi32> to vector<1x64xf32>
    %182 = vector.broadcast %181 : vector<1x64xf32> to vector<32x64xf32>
    %183 = arith.mulf %5, %182 : vector<32x64xf32>
    %cst_52 = arith.constant dense<0.000000e+00> : vector<32x32xf32>
    %184 = tpu.matmul %183, %7, %cst_52 {dimension_numbers = #tpu.dot_dimension_numbers<[1], [1], [0], [0], [0, 0, 1, 0], [], []>} : vector<32x64xf32>, vector<32x64xf32>, vector<32x32xf32> -> vector<32x32xf32>
    %cst_53 = arith.constant 2.500000e-01 : f32
    %185 = vector.broadcast %cst_53 : f32 to vector<32x32xf32>
    %186 = arith.mulf %184, %185 : vector<32x32xf32>
    %187 = arith.addf %186, %10 : vector<32x32xf32>
    %cst_54 = arith.constant dense<0xFF800000> : vector<32xf32>
    %188 = vector.multi_reduction <maximumf>, %187, %cst_54 [1] : vector<32x32xf32> to vector<32xf32>
    %189 = vector.shape_cast %188 : vector<32xf32> to vector<32x1xf32>
    %190 = vector.broadcast %189 : vector<32x1xf32> to vector<32x32xf32>
    %191 = arith.subf %187, %190 : vector<32x32xf32>
    %192 = math.exp %191 : vector<32x32xf32>
    %cst_55 = arith.constant dense<0.000000e+00> : vector<32xf32>
    %193 = vector.multi_reduction <add>, %192, %cst_55 [1] : vector<32x32xf32> to vector<32xf32>
    %194 = vector.shape_cast %193 : vector<32xf32> to vector<32x1xf32>
    %195 = tpu.reciprocal %194 {approx = true} : vector<32x1xf32> -> vector<32x1xf32>
    %196 = vector.broadcast %195 : vector<32x1xf32> to vector<32x32xf32>
    %197 = arith.mulf %192, %196 : vector<32x32xf32>
    %198 = vector.broadcast %181 : vector<1x64xf32> to vector<32x64xf32>
    %199 = arith.mulf %9, %198 : vector<32x64xf32>
    %cst_56 = arith.constant dense<0.000000e+00> : vector<32x64xf32>
    %200 = tpu.matmul %197, %199, %cst_56 {dimension_numbers = #tpu.dot_dimension_numbers<[1], [0], [0], [1], [0, 0, 1, 1], [], []>} : vector<32x32xf32>, vector<32x64xf32>, vector<32x64xf32> -> vector<32x64xf32>
    %201 = arith.addf %174, %200 : vector<32x64xf32>
    %c56_i32_57 = arith.constant 56 : i32
    %202 = vector.broadcast %c56_i32_57 : i32 to vector<1x64xi32>
    %203 = arith.cmpi sge, %11, %202 : vector<1x64xi32>
    %c64_i32 = arith.constant 64 : i32
    %204 = vector.broadcast %c64_i32 : i32 to vector<1x64xi32>
    %205 = arith.cmpi slt, %11, %204 : vector<1x64xi32>
    %206 = arith.andi %203, %205 : vector<1x64xi1>
    %207 = arith.extui %206 : vector<1x64xi1> to vector<1x64xi32>
    %208 = arith.sitofp %207 : vector<1x64xi32> to vector<1x64xf32>
    %209 = vector.broadcast %208 : vector<1x64xf32> to vector<32x64xf32>
    %210 = arith.mulf %5, %209 : vector<32x64xf32>
    %cst_58 = arith.constant dense<0.000000e+00> : vector<32x32xf32>
    %211 = tpu.matmul %210, %7, %cst_58 {dimension_numbers = #tpu.dot_dimension_numbers<[1], [1], [0], [0], [0, 0, 1, 0], [], []>} : vector<32x64xf32>, vector<32x64xf32>, vector<32x32xf32> -> vector<32x32xf32>
    %cst_59 = arith.constant 2.500000e-01 : f32
    %212 = vector.broadcast %cst_59 : f32 to vector<32x32xf32>
    %213 = arith.mulf %211, %212 : vector<32x32xf32>
    %214 = arith.addf %213, %10 : vector<32x32xf32>
    %cst_60 = arith.constant dense<0xFF800000> : vector<32xf32>
    %215 = vector.multi_reduction <maximumf>, %214, %cst_60 [1] : vector<32x32xf32> to vector<32xf32>
    %216 = vector.shape_cast %215 : vector<32xf32> to vector<32x1xf32>
    %217 = vector.broadcast %216 : vector<32x1xf32> to vector<32x32xf32>
    %218 = arith.subf %214, %217 : vector<32x32xf32>
    %219 = math.exp %218 : vector<32x32xf32>
    %cst_61 = arith.constant dense<0.000000e+00> : vector<32xf32>
    %220 = vector.multi_reduction <add>, %219, %cst_61 [1] : vector<32x32xf32> to vector<32xf32>
    %221 = vector.shape_cast %220 : vector<32xf32> to vector<32x1xf32>
    %222 = tpu.reciprocal %221 {approx = true} : vector<32x1xf32> -> vector<32x1xf32>
    %223 = vector.broadcast %222 : vector<32x1xf32> to vector<32x32xf32>
    %224 = arith.mulf %219, %223 : vector<32x32xf32>
    %225 = vector.broadcast %208 : vector<1x64xf32> to vector<32x64xf32>
    %226 = arith.mulf %9, %225 : vector<32x64xf32>
    %cst_62 = arith.constant dense<0.000000e+00> : vector<32x64xf32>
    %227 = tpu.matmul %224, %226, %cst_62 {dimension_numbers = #tpu.dot_dimension_numbers<[1], [0], [0], [1], [0, 0, 1, 1], [], []>} : vector<32x32xf32>, vector<32x64xf32>, vector<32x64xf32> -> vector<32x64xf32>
    %228 = arith.addf %201, %227 : vector<32x64xf32>
    %c0_63 = arith.constant 0 : index
    %c0_64 = arith.constant 0 : index
    %c0_65 = arith.constant 0 : index
    %229 = vector.load %arg7[%c0_63, %c0_64, %c0_65] : memref<1x32x64xf32, #tpu.memory_space<vmem>>, vector<1x32x64xf32>
    %230 = vector.shape_cast %229 : vector<1x32x64xf32> to vector<32x64xf32>
    %231 = vector.shape_cast %228 : vector<32x64xf32> to vector<1x32x64xf32>
    tpu.vector_store %arg7[%c0_63, %c0_64, %c0_65], %231 {strides = array<i32>} : memref<1x32x64xf32, #tpu.memory_space<vmem>>, vector<1x32x64xf32>,
    return
  }
  func.func @transform_0(%arg0: i32) -> (i32, i32, i32) {
    %c0_i32 = arith.constant 0 : i32
    %c0_i32_0 = arith.constant 0 : i32
    %c0_i32_1 = arith.constant 0 : i32
    return %arg0, %c0_i32, %c0_i32_0 : i32, i32, i32
  }
  func.func @transform_1(%arg0: i32) -> (i32, i32, i32) {
    %c0_i32 = arith.constant 0 : i32
    %c0_i32_0 = arith.constant 0 : i32
    %c0_i32_1 = arith.constant 0 : i32
    return %arg0, %c0_i32, %c0_i32_0 : i32, i32, i32
  }
  func.func @transform_2(%arg0: i32) -> (i32, i32) {
    %c0_i32 = arith.constant 0 : i32
    %c0_i32_0 = arith.constant 0 : i32
    %c0_i32_1 = arith.constant 0 : i32
    return %c0_i32, %c0_i32_0 : i32, i32
  }
  func.func @transform_3(%arg0: i32) -> (i32, i32) {
    %c0_i32 = arith.constant 0 : i32
    %c0_i32_0 = arith.constant 0 : i32
    %c0_i32_1 = arith.constant 0 : i32
    return %c0_i32, %c0_i32_0 : i32, i32
  }
  func.func @transform_4(%arg0: i32) -> (i32, i32) {
    %c0_i32 = arith.constant 0 : i32
    %c0_i32_0 = arith.constant 0 : i32
    %c0_i32_1 = arith.constant 0 : i32
    return %c0_i32, %c0_i32_0 : i32, i32
  }
  func.func @transform_5(%arg0: i32) -> (i32, i32) {
    %c0_i32 = arith.constant 0 : i32
    %c0_i32_0 = arith.constant 0 : i32
    %c0_i32_1 = arith.constant 0 : i32
    return %c0_i32, %c0_i32_0 : i32, i32
  }
  func.func @transform_6(%arg0: i32) -> (i32, i32, i32) {
    %c0_i32 = arith.constant 0 : i32
    %c0_i32_0 = arith.constant 0 : i32
    %c0_i32_1 = arith.constant 0 : i32
    return %arg0, %c0_i32, %c0_i32_0 : i32, i32, i32
  }
}

module attributes {stable_mosaic.version = 11 : i64} {
  func.func @_proj_bias_kernel(%arg0: i32, %arg1: memref<64x64xf32, #tpu.memory_space<vmem>>, %arg2: memref<64x128xf32, #tpu.memory_space<vmem>>, %arg3: memref<1x128xf32, #tpu.memory_space<vmem>>, %arg4: memref<64x128xf32, #tpu.memory_space<vmem>>) attributes {dimension_semantics = [#tpu.dimension_semantics<parallel>], iteration_bounds = array<i64: 1>, scalar_prefetch = 0 : i64, scratch_operands = 0 : i64, tpu.core_type = #tpu.core_type<tc>, window_params = [{transform_indices = @transform_0, window_bounds = array<i64: 64, 64>}, {pipeline_mode = #tpu.pipeline_mode<synchronous>, transform_indices = @transform_1, window_bounds = array<i64: 64, 128>}, {pipeline_mode = #tpu.pipeline_mode<synchronous>, transform_indices = @transform_2, window_bounds = array<i64: 1, 128>}, {transform_indices = @transform_3, window_bounds = array<i64: 64, 128>}]} {
    %c0 = arith.constant 0 : index
    %c0_0 = arith.constant 0 : index
    %0 = vector.load %arg1[%c0, %c0_0] : memref<64x64xf32, #tpu.memory_space<vmem>>, vector<64x64xf32>
    %c0_1 = arith.constant 0 : index
    %c0_2 = arith.constant 0 : index
    %1 = vector.load %arg2[%c0_1, %c0_2] : memref<64x128xf32, #tpu.memory_space<vmem>>, vector<64x128xf32>
    %cst = arith.constant dense<0.000000e+00> : vector<64x128xf32>
    %2 = tpu.matmul %0, %1, %cst {dimension_numbers = #tpu.dot_dimension_numbers<[1], [0], [0], [1], [0, 0, 1, 1], [], []>} : vector<64x64xf32>, vector<64x128xf32>, vector<64x128xf32> -> vector<64x128xf32>
    %c0_3 = arith.constant 0 : index
    %c0_4 = arith.constant 0 : index
    %3 = vector.load %arg3[%c0_3, %c0_4] : memref<1x128xf32, #tpu.memory_space<vmem>>, vector<1x128xf32>
    %4 = vector.broadcast %3 : vector<1x128xf32> to vector<64x128xf32>
    %5 = arith.addf %2, %4 : vector<64x128xf32>
    %c0_5 = arith.constant 0 : index
    %c0_6 = arith.constant 0 : index
    %6 = vector.load %arg4[%c0_5, %c0_6] : memref<64x128xf32, #tpu.memory_space<vmem>>, vector<64x128xf32>
    tpu.vector_store %arg4[%c0_5, %c0_6], %5 {strides = array<i32>} : memref<64x128xf32, #tpu.memory_space<vmem>>, vector<64x128xf32>,
    return
  }
  func.func @transform_0(%arg0: i32) -> (i32, i32) {
    %c0_i32 = arith.constant 0 : i32
    %c0_i32_0 = arith.constant 0 : i32
    return %arg0, %c0_i32 : i32, i32
  }
  func.func @transform_1(%arg0: i32) -> (i32, i32) {
    %c0_i32 = arith.constant 0 : i32
    %c0_i32_0 = arith.constant 0 : i32
    %c0_i32_1 = arith.constant 0 : i32
    return %c0_i32, %c0_i32_0 : i32, i32
  }
  func.func @transform_2(%arg0: i32) -> (i32, i32) {
    %c0_i32 = arith.constant 0 : i32
    %c0_i32_0 = arith.constant 0 : i32
    %c0_i32_1 = arith.constant 0 : i32
    return %c0_i32, %c0_i32_0 : i32, i32
  }
  func.func @transform_3(%arg0: i32) -> (i32, i32) {
    %c0_i32 = arith.constant 0 : i32
    %c0_i32_0 = arith.constant 0 : i32
    return %arg0, %c0_i32 : i32, i32
  }
}

</mosaic_0001>

<bundles_post_ra>
// kernel: efficient_cross_attention.3
= control target key start
LH: loop header
LB: loop body
LE: loop exit
PB: predicated region body
PF: predicated region fallthrough
CT: control target
= control target key end

     0   :  { %vm38_vm0 = vcmask 523264   ;;  %s390_s0 = inlined_call_operand.vmem [shape: f32[64,64], index: 0, kind: input, shape index: {}]   ;;  %s391_s1 = inlined_call_operand.vmem [shape: f32[64,128], index: 1, kind: input, shape index: {}]   ;;  %s392_s2 = inlined_call_operand.vmem [shape: f32[1,128], index: 2, kind: input, shape index: {}]   ;;  %s393_s3 = inlined_call_operand.hbm [shape: f32[64,128], index: 3, kind: output, shape index: {}]  }
   0x1   :  { %v23_v0 = vld [vmem:[%s391_s1] sm:$0xff]  ;;  %v24_v1 = vld [vmem:[%s391_s1 + $0x8] sm:$0xff]  ;;  %v25_v2 = vld [vmem:[%s391_s1 + $0x10] sm:$0xff] }
   0x2   :  { %v245_v3 = vpack.c.bf16 %v24_v1, %v23_v0  ;;  %v26_v4 = vld [vmem:[%s391_s1 + $0x18] sm:$0xff]  ;;  %v27_v6 = vld [vmem:[%s391_s1 + $0x20] sm:$0xff]  ;;  %v28_v7 = vld [vmem:[%s391_s1 + $0x28] sm:$0xff] }
   0x3   :  { %v249_v5 = vpack.c.bf16 %v26_v4, %v25_v2  ;;  %v15_v8 = vld [vmem:[%s390_s0] sm:$0xff]  ;;  %v253_v10 = vpack.c.bf16 %v28_v7, %v27_v6 }
   0x4   :  { %246 = vmatprep.subr.bf16.mxu0 %v245_v3  ;;  %261 = vmatprep.subr.bf16.mxu1 %v245_v3  ;;  %v19_v9 = vld [vmem:[%s390_s0 + $0x20] sm:$0xff] }
   0x5   :  { %248 = vmatpush3.bf16.msra.mxu0 %v245_v3  ;;  %265 = vmatpush3.bf16.msra.mxu1 %v245_v3 }
   0x6   :  { %250 = vmatprep.subr.bf16.mxu0 %v249_v5  ;;  %262 = vmatprep.subr.bf16.mxu1 %v249_v5 }
   0x7   :  { %8 = vsyncpa [#allocation3], 0  ;;  %v29_v11 = vld [vmem:[%s391_s1 + $0x30] sm:$0xff]  ;;  %v30_v12 = vld [vmem:[%s391_s1 + $0x38] sm:$0xff]  ;;  %233 = vmatprep.mubr.msk.f32.mxu0 %vm38_vm0, %v15_v8  ;;  %239 = vmatprep.mubr.msk.f32.mxu1 %vm38_vm0, %v19_v9  ;;  %s296_s18 = smov [#allocation2]  }
   0x8   :  { %v257_v13 = vpack.c.bf16 %v30_v12, %v29_v11  ;;  %v16_v14 = vld [vmem:[%s390_s0 + $0x8] sm:$0xff]  ;;  %v17_v16 = vld [vmem:[%s390_s0 + $0x10] sm:$0xff]  ;;  %v18_v18 = vld [vmem:[%s390_s0 + $0x18] sm:$0xff]  ;;  %s181_s19 = sshll.u32 %s296_s18, 4  ;;  %s182_s19 = int_to_ptr.vmem [resolvable:$true] %s181_s19 }
   0x9   :  { %252 = vmatpush3.bf16.msra.mxu0 %v249_v5  ;;  %266 = vmatpush3.bf16.msra.mxu1 %v249_v5  ;;  %v20_v15 = vld [vmem:[%s390_s0 + $0x28] sm:$0xff]  ;;  %v21_v17 = vld [vmem:[%s390_s0 + $0x30] sm:$0xff]  ;;  %v22_v19 = vld [vmem:[%s390_s0 + $0x38] sm:$0xff]  ;;  %s272_s0 = scalar_lea.vmem %s182_s19, 1024  ;;  %p277_p1 = scmp.lt.s32.totalorder %s182_s19, %s182_s19 }
   0xa   :  { %254 = vmatprep.subr.bf16.mxu0 %v253_v10  ;;  %263 = vmatprep.subr.bf16.mxu1 %v253_v10  ;;  %v192_v20 = vld [vmem:[%s392_s2] ss:$0 sm:$0xff]  ;;  %p273_p0 = scmp.ne.s32.totalorder %s182_s19, %s272_s0  ;;  %p278_p2 = scmp.lt.s32.totalorder %s272_s0, %s272_s0 }
   0xc   :  { %p279_p3 = por %p278_p2, %p277_p1 }
   0xd   :  { %256 = vmatpush3.bf16.msra.mxu0 %v253_v10  ;;  %267 = vmatpush3.bf16.msra.mxu1 %v253_v10 }
   0xe   :  { %258 = vmatprep.subr.bf16.mxu0 %v257_v13  ;;  %264 = vmatprep.subr.bf16.mxu1 %v257_v13  ;;  %p280_p4 = pnand %p279_p3, %p273_p0 }
  0x11   :  { %260 = vmatpush3.bf16.msra.mxu0 %v257_v13  ;;  %268 = vmatpush3.bf16.msra.mxu1 %v257_v13 }
  0x14   :  { %234 = vmatmul.mubr.msk.f32.vlgmr.msra.gmra.mrb[0].mxu0 %vm38_vm0, %v16_v14  ;;  %240 = vmatmul.mubr.msk.f32.vlgmr.msra.gmra.mrb[0].mxu1 %vm38_vm0, %v20_v15 }
  0x15   :  { %236 = vmatprep.mubr.msk.f32.mxu0 %vm38_vm0, %v17_v16  ;;  %242 = vmatprep.mubr.msk.f32.mxu1 %vm38_vm0, %v21_v17 }
  0x18   :  { %237 = vmatmul.mubr.msk.f32.gmra.mrb[2].mxu0 %vm38_vm0, %v18_v18  ;;  %243 = vmatmul.mubr.msk.f32.gmra.mrb[2].mxu1 %vm38_vm0, %v22_v19 }
  0xe7   :  { %v235_v21 = vpop.f32.mrb[0].mxu0  ;;  %v241_v22 = vpop.f32.mrb[0].mxu1 }
  0xe8   :  { %v135_v23 = vadd.f32 %v235_v21, %v192_v20  ;;  %v155_v24 = vadd.f32 %v241_v22, %v192_v20  ;;  %v129_v25 = vpop.f32.mrb[1].mxu0  ;;  %v149_v26 = vpop.f32.mrb[1].mxu1 }
  0xe9   :  { %v130_v27 = vadd.f32 %v192_v20, %v129_v25  ;;  %v150_v28 = vadd.f32 %v192_v20, %v149_v26 }
  0xea   :  { %169 = vst [vmem:[#allocation2 + $0x8] sm:$0xff] %v135_v23  ;;  %173 = vst [vmem:[#allocation2 + $0x28] sm:$0xff] %v155_v24 }
  0xeb   :  { %168 = vst [vmem:[#allocation2] sm:$0xff] %v130_v27  ;;  %172 = vst [vmem:[#allocation2 + $0x20] sm:$0xff] %v150_v28  ;;  %v238_v29 = vpop.f32.mrb[2].mxu0  ;;  %v244_v30 = vpop.f32.mrb[2].mxu1 }
  0xec   :  { %v145_v31 = vadd.f32 %v238_v29, %v192_v20  ;;  %v165_v32 = vadd.f32 %v244_v30, %v192_v20  ;;  %v139_v33 = vpop.f32.mrb[3].mxu0  ;;  %v159_v34 = vpop.f32.mrb[3].mxu1 }
  0xed   :  { %v140_v35 = vadd.f32 %v192_v20, %v139_v33  ;;  %v160_v36 = vadd.f32 %v192_v20, %v159_v34 }
  0xee   :  { %171 = vst [vmem:[#allocation2 + $0x18] sm:$0xff] %v145_v31  ;;  %175 = vst [vmem:[#allocation2 + $0x38] sm:$0xff] %v165_v32 }
  0xef   :  { %170 = vst [vmem:[#allocation2 + $0x10] sm:$0xff] %v140_v35  ;;  %174 = vst [vmem:[#allocation2 + $0x30] sm:$0xff] %v160_v36 }
  0xf0   :  { %283 = shalt.err (!%p280_p4)
}
  0xf1   :  { %s284_s21 = scalar_lea.hbm %s393_s3, 1024 }
  0xf2   :  { %p285_p5 = scmp.ne.s32.totalorder %s393_s3, %s284_s21  ;;  %p288_p6 = scmp.lt.u32.totalorder %s284_s21, %s393_s3 }
  0xf4   :  { %p290_p7 = pnand %p288_p6, %p285_p5 }
  0xf6   :  { %293 = shalt.err (!%p290_p7)
}
  0xf7   :  { %s297_s26 = smov 128   ;;  %s298_s27 = smov 8  }
  0xf8   :  { %187 = dma.vmem_to_hbm [thread:$0]  %s182_s19, 1024, %s393_s3, [#allocation3], %s297_s26, %s297_s26, %s298_s27  }
  0xf9   :  { %294 = dma.done.wait [#allocation3], 1024  }
  0xfa   :  { %295 = vsyncadd [#allocation3], 4294966272 }
  0xfb   :  { %191 = vsyncpa [#allocation3], 1 }

// kernel: efficient_cross_attention.2
= control target key start
LH: loop header
LB: loop body
LE: loop exit
PB: predicated region body
PF: predicated region fallthrough
CT: control target
= control target key end

     0   :  { %s3881_s21 = smov 0   ;;  %s4913_s0 = inlined_call_operand.vmem [shape: f32[2,32,128], index: 0, kind: input, shape index: {}]   ;;  %s4914_s1 = inlined_call_operand.vmem [shape: f32[2,32,128], index: 1, kind: input, shape index: {}]   ;;  %s4915_s2 = inlined_call_operand.vmem [shape: f32[128,64], index: 2, kind: input, shape index: {}]   ;;  %s4916_s3 = inlined_call_operand.vmem [shape: f32[128,64], index: 3, kind: input, shape index: {}]   ;;  %s4917_s4 = inlined_call_operand.vmem [shape: f32[128,64], index: 4, kind: input, shape index: {}]   ;;  %s4918_s5 = inlined_call_operand.vmem [shape: f32[32,32], index: 5, kind: input, shape index: {}]   ;;  %s4919_s6 = inlined_call_operand.vmem [shape: f32[2,32,64], index: 6, kind: output, shape index: {}]  }
   0x1 LB: > { %s2770_s22 = sadd.s32 4294967295, %s3843_s21   ;;  %p2774_p0 = scmp.ge.s32.totalorder %s3843_s21, 1  ;;  %s3843_s21 = sphi %s3881_s21, %s16_s21  }
   0x2   : > { %p222_p1 = scmp.lt.s32.totalorder %s3843_s21, 3 }
   0x4   : > { %p223_p2 = pnand %p2774_p0, %p222_p1 }
   0x6   : > { %226 = sbr.rel (%p223_p2) target bundleno = 1650 (0x672), region = 44 }
   0xd   : > { %v381_v0 = vld [vmem:[%s4916_s3] sm:$0xff]  ;;  %v382_v1 = vld [vmem:[%s4916_s3 + $0x8] sm:$0xff]  ;;  %v383_v2 = vld [vmem:[%s4916_s3 + $0x10] sm:$0xff]  ;;  %p257_p3 = scmp.lt.s32.totalorder %s2770_s22, 1  ;;  %v587_v56 = vlaneseq  ;;  %v3845_v58 = vmov 0.0   ;;  %vm598_vm12 = vcmask 523264  }
   0xe   : > { %v3448_v3 = vpack.c.bf16 %v382_v1, %v381_v0  ;;  %v384_v4 = vld [vmem:[%s4916_s3 + $0x18] sm:$0xff]  ;;  %v385_v6 = vld [vmem:[%s4916_s3 + $0x20] sm:$0xff]  ;;  %v386_v7 = vld [vmem:[%s4916_s3 + $0x28] sm:$0xff] }
   0xf   : > { %v3452_v5 = vpack.c.bf16 %v384_v4, %v383_v2  ;;  %v280_v8 = vld [vmem:[%s4915_s2] sm:$0xff]  ;;  %s4925_s22 = smov (!%p257_p3, %s2770_s22), 1  ;;  %v281_v9 = vld [vmem:[%s4915_s2 + $0x8] sm:$0xff]  ;;  %v282_v11 = vld [vmem:[%s4915_s2 + $0x10] sm:$0xff]  ;;  %v3456_v13 = vpack.c.bf16 %v386_v7, %v385_v6  ;;  %v4020_v57 = vand.u32 127, %v587_v56 }
  0x10   : > { %3449 = vmatprep.subr.bf16.mxu1 %v3448_v3  ;;  %v3416_v10 = vpack.c.bf16 %v281_v9, %v280_v8  ;;  %v283_v12 = vld [vmem:[%s4915_s2 + $0x18] sm:$0xff]  ;;  %s3919_s19 = sshll.u32 %s4925_s22, 5  ;;  %v284_v15 = vld [vmem:[%s4915_s2 + $0x20] sm:$0xff]  ;;  %v285_v16 = vld [vmem:[%s4915_s2 + $0x28] sm:$0xff] }
  0x11   : > { %3451 = vmatpush3.bf16.msra.mxu1 %v3448_v3  ;;  %v3420_v14 = vpack.c.bf16 %v283_v12, %v282_v11  ;;  %s3931_s28 = scalar_lea.vmem %s4914_s1, %s3919_s19  ;;  %v387_v17 = vld [vmem:[%s4916_s3 + $0x30] sm:$0xff]  ;;  %v388_v18 = vld [vmem:[%s4916_s3 + $0x38] sm:$0xff]  ;;  %v3424_v19 = vpack.c.bf16 %v285_v16, %v284_v15  ;;  %s3953_s14 = scalar_lea.vmem %s4913_s0, %s3919_s19  ;;  %v389_v24 = vld [vmem:[%s4916_s3 + $0x40] sm:$0xff]  ;;  %vm1910_vm0 = vcmp.ge.s32.totalorder %v4020_v57, 40  ;;  %vm1911_vm1 = vcmp.lt.s32.totalorder %v4020_v57, 48 }
  0x12   : > { %3453 = vmatprep.subr.bf16.mxu1 %v3452_v5  ;;  %3417 = vmatprep.subr.bf16.mxu0 %v3416_v10  ;;  %v3940_v20 = vld [vmem:[%s3931_s28] sm:$0xff]  ;;  %v3460_v21 = vpack.c.bf16 %v388_v18, %v387_v17  ;;  %v286_v22 = vld [vmem:[%s4915_s2 + $0x30] sm:$0xff]  ;;  %v287_v23 = vld [vmem:[%s4915_s2 + $0x38] sm:$0xff]  ;;  %vm2173_vm2 = vcmp.ge.s32.totalorder %v4020_v57, 48  ;;  %vm2174_vm3 = vcmp.lt.s32.totalorder %v4020_v57, 56  ;;  %vm2436_vm4 = vcmp.ge.s32.totalorder %v4020_v57, 56  ;;  %s271_s22 = scalar_lea.vmem %s4919_s6, %s3919_s19 }
  0x13   : > { %3419 = vmatpush3.bf16.msra.mxu0 %v3416_v10  ;;  %3148 = vmatprep.mubr.f32.mxu1 %v3940_v20  ;;  %v390_v25 = vld [vmem:[%s4916_s3 + $0x48] sm:$0xff]  ;;  %v3428_v26 = vpack.c.bf16 %v287_v23, %v286_v22  ;;  %v272_v27 = vld [vmem:[%s3953_s14] sm:$0xff]  ;;  %v391_v31 = vld [vmem:[%s4916_s3 + $0x50] sm:$0xff]  ;;  %vm2437_vm6 = vcmp.lt.s32.totalorder %v4020_v57, 64  ;;  %vm1647_vm7 = vcmp.ge.s32.totalorder %v4020_v57, 32  ;;  %vm1648_vm8 = vcmp.lt.s32.totalorder %v4020_v57, 40 }
  0x14   : > { %3421 = vmatprep.subr.bf16.mxu0 %v3420_v14  ;;  %v3464_v28 = vpack.c.bf16 %v390_v25, %v389_v24  ;;  %v288_v29 = vld [vmem:[%s4915_s2 + $0x40] sm:$0xff]  ;;  %v289_v30 = vld [vmem:[%s4915_s2 + $0x48] sm:$0xff]  ;;  %3110 = vmatprep.mubr.f32.mxu0 %v272_v27  ;;  %v392_v32 = vld [vmem:[%s4916_s3 + $0x58] sm:$0xff]  ;;  %vm590_vm13 = vcmp.lt.s32.totalorder %v4020_v57, 8  ;;  %vm765_vm15 = vcmp.ge.s32.totalorder %v4020_v57, 8 }
  0x15   : > { %3455 = vmatpush3.bf16.msra.mxu1 %v3452_v5  ;;  %v3432_v33 = vpack.c.bf16 %v289_v30, %v288_v29  ;;  %v3468_v34 = vpack.c.bf16 %v392_v32, %v391_v31  ;;  %v290_v35 = vld [vmem:[%s4915_s2 + $0x50] sm:$0xff]  ;;  %v291_v36 = vld [vmem:[%s4915_s2 + $0x58] sm:$0xff]  ;;  %v393_v37 = vld [vmem:[%s4916_s3 + $0x60] sm:$0xff]  ;;  %v4052_v3 = vsel %vm590_vm13, 1.0, %v3845_v58 }
  0x16   : > { %3457 = vmatprep.subr.bf16.mxu1 %v3456_v13  ;;  %v394_v38 = vld [vmem:[%s4916_s3 + $0x68] sm:$0xff]  ;;  %v3436_v39 = vpack.c.bf16 %v291_v36, %v290_v35  ;;  %v292_v41 = vld [vmem:[%s4915_s2 + $0x60] sm:$0xff]  ;;  %v395_v43 = vld [vmem:[%s4916_s3 + $0x70] sm:$0xff] }
  0x17   : > { %3423 = vmatpush3.bf16.msra.mxu0 %v3420_v14  ;;  %v3472_v40 = vpack.c.bf16 %v394_v38, %v393_v37  ;;  %v293_v42 = vld [vmem:[%s4915_s2 + $0x68] sm:$0xff]  ;;  %v396_v44 = vld [vmem:[%s4916_s3 + $0x78] sm:$0xff]  ;;  %v294_v47 = vld [vmem:[%s4915_s2 + $0x70] sm:$0xff] }
  0x18   : > { %3425 = vmatprep.subr.bf16.mxu0 %v3424_v19  ;;  %v3440_v45 = vpack.c.bf16 %v293_v42, %v292_v41  ;;  %v3476_v46 = vpack.c.bf16 %v396_v44, %v395_v43  ;;  %v295_v48 = vld [vmem:[%s4915_s2 + $0x78] sm:$0xff]  ;;  %v4005_v50 = vld [vmem:[%s3931_s28 + $0x8] sm:$0xff]  ;;  %v4008_v51 = vld [vmem:[%s3931_s28 + $0x10] sm:$0xff] }
  0x19   : > { %3459 = vmatpush3.bf16.msra.mxu1 %v3456_v13  ;;  %v3444_v49 = vpack.c.bf16 %v295_v48, %v294_v47  ;;  %v273_v52 = vld [vmem:[%s3953_s14 + $0x8] sm:$0xff]  ;;  %v4014_v53 = vld [vmem:[%s3931_s28 + $0x18] sm:$0xff]  ;;  %v274_v54 = vld [vmem:[%s3953_s14 + $0x10] sm:$0xff] }
  0x1a   : > { %3461 = vmatprep.subr.bf16.mxu1 %v3460_v21  ;;  %v275_v55 = vld [vmem:[%s3953_s14 + $0x18] sm:$0xff]  ;;  %vm1912_vm5 = vmand %vm1910_vm0, %vm1911_vm1  ;;  %vm766_vm0 = vcmp.lt.s32.totalorder %v4020_v57, 16  ;;  %v483_v47 = vld [vmem:[%s4917_s4 + $0x8] sm:$0xff] }
  0x1b   : > { %3427 = vmatpush3.bf16.msra.mxu0 %v3424_v19  ;;  %v4031_v59 = vsel %vm1912_vm5, 1.0, %v3845_v58  ;;  %vm2175_vm9 = vmand %vm2173_vm2, %vm2174_vm3  ;;  %vm1121_vm2 = vcmp.ge.s32.totalorder %v4020_v57, 16  ;;  %vm1122_vm3 = vcmp.lt.s32.totalorder %v4020_v57, 24  ;;  %vm1384_vm5 = vcmp.ge.s32.totalorder %v4020_v57, 24  ;;  %v484_v48 = vld [vmem:[%s4917_s4 + $0x10] sm:$0xff]  ;;  %v487_v56 = vld [vmem:[%s4917_s4 + $0x28] sm:$0xff] }
  0x1c   : > { %3429 = vmatprep.subr.bf16.mxu0 %v3428_v26  ;;  %v4034_v60 = vsel %vm2175_vm9, 1.0, %v3845_v58  ;;  %vm2438_vm10 = vmand %vm2436_vm4, %vm2437_vm6  ;;  %vm1385_vm6 = vcmp.lt.s32.totalorder %v4020_v57, 32 }
  0x1d   : > { %3463 = vmatpush3.bf16.msra.mxu1 %v3460_v21  ;;  %v4037_v61 = vsel %vm2438_vm10, 1.0, %v3845_v58  ;;  %vm1649_vm11 = vmand %vm1647_vm7, %vm1648_vm8  ;;  %vm716_vm8 = vcmask 261120  }
  0x1e   : > { %3465 = vmatprep.subr.bf16.mxu1 %v3464_v28  ;;  %v4040_v62 = vsel %vm1649_vm11, 1.0, %v3845_v58  ;;  %vm4045_vm14 = vmpackc.low %vm598_vm12, %vm598_vm12 }
  0x1f   : > { %3431 = vmatpush3.bf16.msra.mxu0 %v3428_v26  ;;  %vm767_vm1 = vmand %vm765_vm15, %vm766_vm0 }
  0x20   : > { %3433 = vmatprep.subr.bf16.mxu0 %v3432_v33  ;;  %v4108_v19 = vsel %vm767_vm1, 1.0, %v3845_v58  ;;  %vm1123_vm4 = vmand %vm1121_vm2, %vm1122_vm3 }
  0x21   : > { %3467 = vmatpush3.bf16.msra.mxu1 %v3464_v28  ;;  %v4135_v23 = vsel %vm1123_vm4, 1.0, %v3845_v58  ;;  %vm1386_vm7 = vmand %vm1384_vm5, %vm1385_vm6 }
  0x22   : > { %3469 = vmatprep.subr.bf16.mxu1 %v3468_v34  ;;  %v4164_v28 = vsel %vm1386_vm7, 1.0, %v3845_v58  ;;  %v488_v58 = vld [vmem:[%s4917_s4 + $0x30] sm:$0xff] }
  0x23   : > { %3435 = vmatpush3.bf16.msra.mxu0 %v3432_v33 }
  0x24   : > { %3437 = vmatprep.subr.bf16.mxu0 %v3436_v39 }
  0x25   : > { %3471 = vmatpush3.bf16.msra.mxu1 %v3468_v34 }
  0x26   : > { %3473 = vmatprep.subr.bf16.mxu1 %v3472_v40 }
  0x27   : > { %3439 = vmatpush3.bf16.msra.mxu0 %v3436_v39 }
  0x28   : > { %3441 = vmatprep.subr.bf16.mxu0 %v3440_v45 }
  0x29   : > { %3475 = vmatpush3.bf16.msra.mxu1 %v3472_v40 }
  0x2a   : > { %3477 = vmatprep.subr.bf16.mxu1 %v3476_v46 }
  0x2b   : > { %3443 = vmatpush3.bf16.msra.mxu0 %v3440_v45 }
  0x2c   : > { %3445 = vmatprep.subr.bf16.mxu0 %v3444_v49 }
  0x2d   : > { %3479 = vmatpush3.bf16.msra.mxu1 %v3476_v46  ;;  %v482_v46 = vld [vmem:[%s4917_s4] sm:$0xff] }
  0x2f   : > { %3447 = vmatpush3.bf16.msra.mxu0 %v3444_v49  ;;  %v3480_v49 = vpack.c.bf16 %v483_v47, %v482_v46 }
  0x30   : > { %3149 = vmatmul.mubr.f32.vlgmr.msra.gmra.mrb[0].mxu1 %v4005_v50 }
  0x31   : > { %3151 = vmatprep.mubr.f32.mxu1 %v4008_v51  ;;  %3481 = vmatprep.subr.bf16.mxu0 %v3480_v49 }
  0x32   : > { %3111 = vmatmul.mubr.f32.vlgmr.msra.gmra.mrb[0].mxu0 %v273_v52  ;;  %v485_v52 = vld [vmem:[%s4917_s4 + $0x18] sm:$0xff] }
  0x33   : > { %3113 = vmatprep.mubr.f32.mxu0 %v274_v54  ;;  %v3484_v54 = vpack.c.bf16 %v485_v52, %v484_v48  ;;  %3483 = vmatpush3.bf16.msra.mxu0 %v3480_v49 }
  0x34   : > { %3152 = vmatmul.mubr.f32.gmra.mrb[2].mxu1 %v4014_v53 }
  0x35   : > { %3485 = vmatprep.subr.bf16.mxu0 %v3484_v54 }
  0x36   : > { %3114 = vmatmul.mubr.f32.gmra.mrb[2].mxu0 %v275_v55  ;;  %v486_v55 = vld [vmem:[%s4917_s4 + $0x20] sm:$0xff] }
  0x37   : > { %3186 = vmatprep.mubr.f32.mxu0 %v3940_v20  ;;  %3487 = vmatpush3.bf16.msra.mxu0 %v3484_v54  ;;  %v3488_v57 = vpack.c.bf16 %v487_v56, %v486_v55 }
  0x39   : > { %3489 = vmatprep.subr.bf16.mxu0 %v3488_v57 }
  0x3b   : > { %3491 = vmatpush3.bf16.msra.mxu0 %v3488_v57 }
 0x103   : > { %v3150_v63 = vpop.f32.mrb[0].mxu1 }
 0x104   : > { %v463_v0 = vpop.f32.mrb[1].mxu1 }
 0x105   : > { %v4049_v2 = vpack.c.bf16 %v3150_v63, %v463_v0  ;;  %v4054_v4 = vpop.f32.mrb[0].mxu0  ;;  %v489_v63 = vld [vmem:[%s4917_s4 + $0x38] sm:$0xff] }
 0x106   : > { %v4059_v6 = vpop.f32.mrb[1].mxu0  ;;  %v4082_v13 = vmul.f32 %v4054_v4, %v4040_v62  ;;  %v595_v16 = vmul.f32 %v4054_v4, %v4052_v3  ;;  %v771_v21 = vmul.f32 %v4054_v4, %v4108_v19  ;;  %v1127_v26 = vmul.f32 %v4054_v4, %v4135_v23 }
 0x107   : > { %3514 = vmatprep.subr.msk.bf16.mxu1 %vm4045_vm14, %v4049_v2  ;;  %v3153_v5 = vpop.f32.mrb[2].mxu1  ;;  %v594_v8 = vmul.f32 %v4052_v3, %v4059_v6  ;;  %v4073_v11 = vmul.f32 %v4040_v62, %v4059_v6  ;;  %v770_v20 = vmul.f32 %v4108_v19, %v4059_v6  ;;  %v1126_v25 = vmul.f32 %v4135_v23, %v4059_v6 }
 0x108   : > { %3517 = vmatpush3.bf16.xpose.msk.msra.mxu1 %vm4045_vm14, %v4049_v2  ;;  %v473_v7 = vpop.f32.mrb[3].mxu1  ;;  %v1389_v30 = vmul.f32 %v4164_v28, %v4059_v6  ;;  %v1390_v31 = vmul.f32 %v4054_v4, %v4164_v28  ;;  %v1915_v34 = vmul.f32 %v4031_v59, %v4059_v6  ;;  %v1916_v35 = vmul.f32 %v4054_v4, %v4031_v59 }
 0x109   : > { %v4066_v9 = vpack.c.bf16 %v3153_v5, %v473_v7  ;;  %v4068_v10 = vpop.f32.mrb[2].mxu0  ;;  %3200 = vmatprep.mubr.msk.f32.mxu1 %vm598_vm12, %v594_v8  ;;  %v2178_v38 = vmul.f32 %v4034_v60, %v4059_v6  ;;  %v2179_v39 = vmul.f32 %v4054_v4, %v4034_v60  ;;  %v2441_v42 = vmul.f32 %v4037_v61, %v4059_v6  ;;  %v491_v5 = vld [vmem:[%s4917_s4 + $0x48] sm:$0xff]  ;;  %v492_v6 = vld [vmem:[%s4917_s4 + $0x50] sm:$0xff]  ;;  %v493_v8 = vld [vmem:[%s4917_s4 + $0x58] sm:$0xff] }
 0x10a   : > { %v4078_v12 = vpop.f32.mrb[3].mxu0  ;;  %v4090_v15 = vmul.f32 %v4068_v10, %v4040_v62  ;;  %v597_v18 = vmul.f32 %v4068_v10, %v4052_v3  ;;  %v773_v24 = vmul.f32 %v4068_v10, %v4108_v19  ;;  %v1129_v29 = vmul.f32 %v4068_v10, %v4135_v23 }
 0x10b   : > { %3520 = vmatprep.subr.msk.bf16.mxu1 %vm4045_vm14, %v4066_v9  ;;  %v4086_v14 = vmul.f32 %v4040_v62, %v4078_v12  ;;  %v596_v17 = vmul.f32 %v4052_v3, %v4078_v12  ;;  %v772_v22 = vmul.f32 %v4108_v19, %v4078_v12  ;;  %v1128_v27 = vmul.f32 %v4135_v23, %v4078_v12 }
 0x10c   : > { %v1391_v32 = vmul.f32 %v4164_v28, %v4078_v12  ;;  %v1392_v33 = vmul.f32 %v4068_v10, %v4164_v28  ;;  %v1917_v36 = vmul.f32 %v4031_v59, %v4078_v12  ;;  %v1918_v37 = vmul.f32 %v4068_v10, %v4031_v59 }
 0x10d   : > { %v2180_v40 = vmul.f32 %v4034_v60, %v4078_v12  ;;  %v2181_v41 = vmul.f32 %v4068_v10, %v4034_v60  ;;  %v2442_v43 = vmul.f32 %v4054_v4, %v4037_v61  ;;  %v2443_v44 = vmul.f32 %v4037_v61, %v4078_v12  ;;  %v490_v4 = vld [vmem:[%s4917_s4 + $0x40] sm:$0xff] }
 0x10e   : > { %v2444_v45 = vmul.f32 %v4068_v10, %v4037_v61  ;;  %v3492_v0 = vpack.c.bf16 %v489_v63, %v488_v58  ;;  %v3496_v7 = vpack.c.bf16 %v491_v5, %v490_v4  ;;  %v3500_v10 = vpack.c.bf16 %v493_v8, %v492_v6  ;;  %v494_v12 = vld [vmem:[%s4917_s4 + $0x60] sm:$0xff] }
 0x110   : > { %3523 = vmatpush3.bf16.xpose.msk.msra.mxu1 %vm4045_vm14, %v4066_v9  ;;  %3493 = vmatprep.subr.bf16.mxu0 %v3492_v0 }
 0x111   : > { %3526 = vmatprep.subr.msk.bf16.mxu1 %vm4045_vm14, %v4049_v2  ;;  %3495 = vmatpush3.bf16.msra.mxu0 %v3492_v0 }
 0x112   : > { %3497 = vmatprep.subr.bf16.mxu0 %v3496_v7 }
 0x115   : > { %3499 = vmatpush3.bf16.msra.mxu0 %v3496_v7 }
 0x116   : > { %3501 = vmatprep.subr.bf16.mxu0 %v3500_v10 }
 0x117   : > { %3201 = vmatmul.mubr.msk.f32.vlgmr.msra.gmra.mrb[4].mxu1 %vm598_vm12, %v595_v16  ;;  %v495_v16 = vld [vmem:[%s4917_s4 + $0x68] sm:$0xff] }
 0x118   : > { %3529 = vmatpush3.bf16.xpose.msk.msra.mxu1 %vm4045_vm14, %v4049_v2  ;;  %3203 = vmatprep.mubr.msk.f32.mxu1 %vm598_vm12, %v596_v17  ;;  %v3504_v17 = vpack.c.bf16 %v495_v16, %v494_v12 }
 0x119   : > { %3532 = vmatprep.subr.msk.bf16.mxu1 %vm4045_vm14, %v4066_v9  ;;  %3503 = vmatpush3.bf16.msra.mxu0 %v3500_v10 }
 0x11a   : > { %3505 = vmatprep.subr.bf16.mxu0 %v3504_v17 }
 0x11b   : > { %3204 = vmatmul.mubr.msk.f32.gmra.mrb[6].mxu1 %vm598_vm12, %v597_v18  ;;  %v496_v18 = vld [vmem:[%s4917_s4 + $0x70] sm:$0xff] }
 0x11c   : > { %3214 = vmatprep.mubr.msk.f32.mxu1 %vm598_vm12, %v770_v20  ;;  %v497_v20 = vld [vmem:[%s4917_s4 + $0x78] sm:$0xff] }
 0x11d   : > { %3507 = vmatpush3.bf16.msra.mxu0 %v3504_v17 }
 0x120   : > { %3535 = vmatpush3.bf16.xpose.msk.msra.mxu1 %vm4045_vm14, %v4066_v9 }
 0x121   : > { %3554 = vmatprep.subr.msk.bf16.mxu1 %vm4045_vm14, %v4049_v2 }
 0x127   : > { %3215 = vmatmul.mubr.msk.f32.vlgmr.msra.gmra.mrb[8].mxu1 %vm598_vm12, %v771_v21  ;;  %v3508_v21 = vpack.c.bf16 %v497_v20, %v496_v18 }
 0x128   : > { %3217 = vmatprep.mubr.msk.f32.mxu1 %vm598_vm12, %v772_v22  ;;  %3557 = vmatpush3.bf16.xpose.msk.msra.mxu1 %vm4045_vm14, %v4049_v2 }
 0x129   : > { %3560 = vmatprep.subr.msk.bf16.mxu1 %vm4045_vm14, %v4066_v9  ;;  %3509 = vmatprep.subr.bf16.mxu0 %v3508_v21 }
 0x12a   : > { %3511 = vmatpush3.bf16.msra.mxu0 %v3508_v21 }
 0x12b   : > { %3218 = vmatmul.mubr.msk.f32.gmra.mrb[10].mxu1 %vm598_vm12, %v773_v24 }
 0x12c   : > { %3256 = vmatprep.mubr.msk.f32.mxu1 %vm598_vm12, %v1126_v25 }
 0x12d   : > { %3187 = vmatmul.mubr.f32.vlgmr.msra.gmra.mrb[4].mxu0 %v4005_v50 }
 0x12e   : > { %3189 = vmatprep.mubr.f32.mxu0 %v4008_v51 }
 0x130   : > { %3563 = vmatpush3.bf16.xpose.msk.msra.mxu1 %vm4045_vm14, %v4066_v9 }
 0x131   : > { %3574 = vmatprep.subr.msk.bf16.mxu1 %vm4045_vm14, %v4049_v2  ;;  %3190 = vmatmul.mubr.f32.gmra.mrb[6].mxu0 %v4014_v53  ;;  %v4325_v53 = vld [vmem:[%s4918_s5 + $0x8] sm:$0xff] }
 0x137   : > { %3257 = vmatmul.mubr.msk.f32.vlgmr.msra.gmra.mrb[12].mxu1 %vm598_vm12, %v1127_v26 }
 0x138   : > { %3259 = vmatprep.mubr.msk.f32.mxu1 %vm598_vm12, %v1128_v27  ;;  %3577 = vmatpush3.bf16.xpose.msk.msra.mxu1 %vm4045_vm14, %v4049_v2 }
 0x139   : > { %3580 = vmatprep.subr.msk.bf16.mxu1 %vm4045_vm14, %v4066_v9 }
 0x13b   : > { %3260 = vmatmul.mubr.msk.f32.gmra.mrb[14].mxu1 %vm598_vm12, %v1129_v29 }
 0x13c   : > { %3284 = vmatprep.mubr.msk.f32.mxu1 %vm598_vm12, %v1389_v30 }
 0x140   : > { %3583 = vmatpush3.bf16.xpose.msk.msra.mxu1 %vm4045_vm14, %v4066_v9 }
 0x141   : > { %3614 = vmatprep.subr.msk.bf16.mxu1 %vm4045_vm14, %v4049_v2 }
 0x147   : > { %3285 = vmatmul.mubr.msk.f32.vlgmr.msra.gmra.mrb[16].mxu1 %vm598_vm12, %v1390_v31 }
 0x148   : > { %3287 = vmatprep.mubr.msk.f32.mxu1 %vm598_vm12, %v1391_v32  ;;  %3617 = vmatpush3.bf16.xpose.msk.msra.mxu1 %vm4045_vm14, %v4049_v2  ;;  %v4317_v32 = vld [vmem:[%s4918_s5] sm:$0xff] }
 0x149   : > { %3620 = vmatprep.subr.msk.bf16.mxu1 %vm4045_vm14, %v4066_v9 }
 0x14b   : > { %3288 = vmatmul.mubr.msk.f32.gmra.mrb[18].mxu1 %vm598_vm12, %v1392_v33 }
 0x14c   : > { %3340 = vmatprep.mubr.msk.f32.mxu1 %vm598_vm12, %v1915_v34 }
 0x150   : > { %3623 = vmatpush3.bf16.xpose.msk.msra.mxu1 %vm4045_vm14, %v4066_v9 }
 0x151   : > { %3634 = vmatprep.subr.msk.bf16.mxu1 %vm4045_vm14, %v4049_v2 }
 0x157   : > { %3341 = vmatmul.mubr.msk.f32.vlgmr.msra.gmra.mrb[20].mxu1 %vm598_vm12, %v1916_v35 }
 0x158   : > { %3343 = vmatprep.mubr.msk.f32.mxu1 %vm598_vm12, %v1917_v36  ;;  %3637 = vmatpush3.bf16.xpose.msk.msra.mxu1 %vm4045_vm14, %v4049_v2 }
 0x159   : > { %3640 = vmatprep.subr.msk.bf16.mxu1 %vm4045_vm14, %v4066_v9 }
 0x15b   : > { %3344 = vmatmul.mubr.msk.f32.gmra.mrb[22].mxu1 %vm598_vm12, %v1918_v37 }
 0x15c   : > { %3368 = vmatprep.mubr.msk.f32.mxu1 %vm598_vm12, %v2178_v38 }
 0x160   : > { %3643 = vmatpush3.bf16.xpose.msk.msra.mxu1 %vm4045_vm14, %v4066_v9 }
 0x161   : > { %3654 = vmatprep.subr.msk.bf16.mxu1 %vm4045_vm14, %v4049_v2 }
 0x167   : > { %3369 = vmatmul.mubr.msk.f32.vlgmr.msra.gmra.mrb[24].mxu1 %vm598_vm12, %v2179_v39  ;;  %v4335_v39 = vld [vmem:[%s4918_s5 + $0x10] sm:$0xff] }
 0x168   : > { %3371 = vmatprep.mubr.msk.f32.mxu1 %vm598_vm12, %v2180_v40  ;;  %3657 = vmatpush3.bf16.xpose.msk.msra.mxu1 %vm4045_vm14, %v4049_v2 }
 0x169   : > { %3660 = vmatprep.subr.msk.bf16.mxu1 %vm4045_vm14, %v4066_v9 }
 0x16b   : > { %3372 = vmatmul.mubr.msk.f32.gmra.mrb[26].mxu1 %vm598_vm12, %v2181_v41 }
 0x16c   : > { %3396 = vmatprep.mubr.msk.f32.mxu1 %vm598_vm12, %v2441_v42 }
 0x170   : > { %3663 = vmatpush3.bf16.xpose.msk.msra.mxu1 %vm4045_vm14, %v4066_v9 }
 0x177   : > { %3397 = vmatmul.mubr.msk.f32.vlgmr.msra.gmra.mrb[28].mxu1 %vm598_vm12, %v2442_v43  ;;  %v4346_v43 = vld [vmem:[%s4918_s5 + $0x18] sm:$0xff] }
 0x178   : > { %3399 = vmatprep.mubr.msk.f32.mxu1 %vm598_vm12, %v2443_v44 }
 0x17b   : > { %3400 = vmatmul.mubr.msk.f32.gmra.mrb[30].mxu1 %vm598_vm12, %v2444_v45 }
 0x1ea   : > { %v3202_v22 = vpop.f32.mrb[4].mxu1 }
 0x1eb   : > { %v689_v24 = vpop.f32.mrb[5].mxu1  ;;  %v709_v41 = vmul.f32 0.25, %v3202_v22 }
 0x1ec   : > { %v708_v51 = vmul.f32 0.25, %v689_v24 }
 0x1ed   : > { %v4360_v54 = vadd.f32 %v709_v41, %v4325_v53 }
 0x1ee   : > { %v3205_v25 = vpop.f32.mrb[6].mxu1  ;;  %v4341_v42 = vadd.f32 %v708_v51, %v4317_v32 }
 0x1ef   : > { %v699_v26 = vpop.f32.mrb[7].mxu1  ;;  %v711_v48 = vmul.f32 0.25, %v3205_v25  ;;  %v720_v4 = vsel %vm716_vm8, %v4360_v54, -inf }
 0x1f0   : > { %v710_v44 = vmul.f32 0.25, %v699_v26  ;;  %v717_v49 = vsel %vm716_vm8, %v4341_v42, -inf }
 0x1f1   : > { %v4366_v58 = vadd.f32 %v711_v48, %v4346_v43 }
 0x1f2   : > { %v4363_v55 = vadd.f32 %v710_v44, %v4335_v39 }
 0x1f3   : > { %v726_v10 = vsel %vm716_vm8, %v4366_v58, -inf }
 0x1f4   : > { %v723_v5 = vsel %vm716_vm8, %v4363_v55, -inf }
 0x1fa   : > { %v3216_v27 = vpop.f32.mrb[8].mxu1 }
 0x1fb   : > { %v852_v29 = vpop.f32.mrb[9].mxu1  ;;  %v872_v30 = vmul.f32 0.25, %v3216_v27 }
 0x1fc   : > { %v871_v31 = vmul.f32 0.25, %v852_v29 }
 0x1fd   : > { %v4330_v38 = vadd.f32 %v872_v30, %v4325_v53 }
 0x1fe   : > { %v3219_v33 = vpop.f32.mrb[10].mxu1  ;;  %v4320_v50 = vadd.f32 %v871_v31, %v4317_v32 }
 0x1ff   : > { %v862_v34 = vpop.f32.mrb[11].mxu1  ;;  %v874_v35 = vmul.f32 0.25, %v3219_v33  ;;  %v882_v45 = vsel %vm716_vm8, %v4330_v38, -inf }
 0x200   : > { %v873_v36 = vmul.f32 0.25, %v862_v34  ;;  %v879_v37 = vsel %vm716_vm8, %v4320_v50, -inf }
 0x201   : > { %880 = vmax.xlane.f32.xlu0 %v879_v37  ;;  %v4353_v47 = vadd.f32 %v874_v35, %v4346_v43 }
 0x202   : > { %v4338_v40 = vadd.f32 %v873_v36, %v4335_v39 }
 0x203   : > { %v888_v52 = vsel %vm716_vm8, %v4353_v47, -inf }
 0x204   : > { %v885_v46 = vsel %vm716_vm8, %v4338_v40, -inf }
 0x205   : > { %883 = vmax.xlane.f32.xlu0 %v882_v45  ;;  %886 = vmax.xlane.f32.xlu1 %v885_v46 }
 0x209   : > { %718 = vmax.xlane.f32.xlu0 %v717_v49  ;;  %889 = vmax.xlane.f32.xlu1 %v888_v52 }
 0x20a   : > { %v3258_v56 = vpop.f32.mrb[12].mxu1 }
 0x20b   : > { %v1208_v57 = vpop.f32.mrb[13].mxu1  ;;  %v1228_v63 = vmul.f32 0.25, %v3258_v56 }
 0x20c   : > { %v1227_v0 = vmul.f32 0.25, %v1208_v57 }
 0x20d   : > { %721 = vmax.xlane.f32.xlu1 %v720_v4  ;;  %724 = vmax.xlane.f32.xlu0 %v723_v5  ;;  %v4380_v18 = vadd.f32 %v1228_v63, %v4325_v53 }
 0x20e   : > { %v3261_v6 = vpop.f32.mrb[14].mxu1  ;;  %v4373_v7 = vadd.f32 %v1227_v0, %v4317_v32 }
 0x20f   : > { %v1218_v8 = vpop.f32.mrb[15].mxu1  ;;  %v1230_v12 = vmul.f32 0.25, %v3261_v6  ;;  %v1238_v21 = vsel %vm716_vm8, %v4380_v18, -inf }
 0x210   : > { %v1229_v16 = vmul.f32 0.25, %v1218_v8  ;;  %v1235_v17 = vsel %vm716_vm8, %v4373_v7, -inf }
 0x211   : > { %727 = vmax.xlane.f32.xlu1 %v726_v10  ;;  %1236 = vmax.xlane.f32.xlu0 %v1235_v17  ;;  %v4390_v24 = vadd.f32 %v1230_v12, %v4346_v43 }
 0x212   : > { %v4383_v20 = vadd.f32 %v1229_v16, %v4335_v39 }
 0x213   : > { %v1244_v25 = vsel %vm716_vm8, %v4390_v24, -inf }
 0x214   : > { %v1241_v22 = vsel %vm716_vm8, %v4383_v20, -inf }
 0x215   : > { %1239 = vmax.xlane.f32.xlu1 %v1238_v21  ;;  %1242 = vmax.xlane.f32.xlu0 %v1241_v22 }
 0x219   : > { %1245 = vmax.xlane.f32.xlu1 %v1244_v25 }
 0x21a   : > { %v3286_v26 = vpop.f32.mrb[16].mxu1 }
 0x21b   : > { %v1491_v27 = vmul.f32 0.25, %v3286_v26  ;;  %v1471_v29 = vpop.f32.mrb[17].mxu1 }
 0x21c   : > { %v1490_v30 = vmul.f32 0.25, %v1471_v29 }
 0x21d   : > { %v4395_v31 = vadd.f32 %v1491_v27, %v4325_v53 }
 0x21e   : > { %v3289_v33 = vpop.f32.mrb[18].mxu1  ;;  %v4398_v51 = vadd.f32 %v1490_v30, %v4317_v32 }
 0x21f   : > { %v1493_v34 = vmul.f32 0.25, %v3289_v33  ;;  %v1481_v35 = vpop.f32.mrb[19].mxu1  ;;  %v1501_v36 = vsel %vm716_vm8, %v4395_v31, -inf }
 0x220   : > { %v1492_v37 = vmul.f32 0.25, %v1481_v35  ;;  %1502 = vmax.xlane.f32.xlu1 %v1501_v36  ;;  %v1498_v41 = vsel %vm716_vm8, %v4398_v51, -inf }
 0x221   : > { %1499 = vmax.xlane.f32.xlu0 %v1498_v41  ;;  %v4405_v44 = vadd.f32 %v1493_v34, %v4346_v43 }
 0x222   : > { %v4408_v45 = vadd.f32 %v1492_v37, %v4335_v39 }
 0x223   : > { %v1507_v46 = vsel %vm716_vm8, %v4405_v44, -inf }
 0x224   : > { %1508 = vmax.xlane.f32.xlu1 %v1507_v46  ;;  %v1504_v48 = vsel %vm716_vm8, %v4408_v45, -inf }
 0x225   : > { %1505 = vmax.xlane.f32.xlu0 %v1504_v48 }
 0x22a   : > { %v4414_v49 = vpop.f32.mrb[20].mxu1 }
 0x22b   : > { %v4416_v52 = vpop.f32.mrb[21].mxu1 }
 0x22e   : > { %v4418_v56 = vpop.f32.mrb[22].mxu1 }
 0x22f   : > { %v4420_v57 = vpop.f32.mrb[23].mxu1 }
 0x23a   : > { %v4422_v63 = vpop.f32.mrb[24].mxu1 }
 0x23b   : > { %v4424_v0 = vpop.f32.mrb[25].mxu1 }
 0x23e   : > { %v4426_v4 = vpop.f32.mrb[26].mxu1 }
 0x23f   : > { %v4428_v5 = vpop.f32.mrb[27].mxu1 }
 0x24a   : > { %v4430_v6 = vpop.f32.mrb[28].mxu1 }
 0x24b   : > { %v4432_v8 = vpop.f32.mrb[29].mxu1 }
 0x24e   : > { %v4434_v10 = vpop.f32.mrb[30].mxu1 }
 0x24f   : > { %v4436_v12 = vpop.f32.mrb[31].mxu1 }
 0x250   : > { %4922 = vst [vmem:[#allocation2_spill] sm:$0xff] %v4436_v12 }
 0x28e   : > { %v881_v16 = vpop.xlane.xlu0 %880 }
 0x28f   : > { %v891_v17 = vsub.f32 %v4320_v50, %v881_v16 }
 0x291   : > { %v895_v21 = vmul.f32 1.442695, %v891_v17 }
 0x292   : > { %v884_v22 = vpop.xlane.xlu0 %883  ;;  %v887_v25 = vpop.xlane.xlu1 %886 }
 0x293   : > { %3709 = vpow2.f32 %v895_v21  ;;  %v892_v26 = vsub.f32 %v4330_v38, %v884_v22  ;;  %v893_v27 = vsub.f32 %v4338_v40, %v887_v25 }
 0x295   : > { %v897_v29 = vmul.f32 1.442695, %v892_v26  ;;  %v899_v30 = vmul.f32 1.442695, %v893_v27 }
 0x296   : > { %v719_v33 = vpop.xlane.xlu0 %718  ;;  %v890_v34 = vpop.xlane.xlu1 %889 }
 0x297   : > { %3711 = vpow2.f32 %v897_v29  ;;  %v729_v35 = vsub.f32 %v4341_v42, %v719_v33  ;;  %v894_v36 = vsub.f32 %v4353_v47, %v890_v34 }
 0x298   : > { %3713 = vpow2.f32 %v899_v30 }
 0x299   : > { %v733_v37 = vmul.f32 1.442695, %v729_v35  ;;  %v901_v50 = vmul.f32 1.442695, %v894_v36 }
 0x29a   : > { %v722_v41 = vpop.xlane.xlu1 %721  ;;  %v725_v46 = vpop.xlane.xlu0 %724 }
 0x29b   : > { %3715 = vpow2.f32 %v733_v37  ;;  %v730_v48 = vsub.f32 %v4360_v54, %v722_v41  ;;  %v731_v38 = vsub.f32 %v4363_v55, %v725_v46 }
 0x29c   : > { %3717 = vpow2.f32 %v901_v50 }
 0x29d   : > { %v4445_v40 = vpop.eup %3709  ;;  %v735_v16 = vmul.f32 1.442695, %v730_v48  ;;  %v737_v17 = vmul.f32 1.442695, %v731_v38  ;;  %v4470_v48 = vpop.f32.mrb[4].mxu0 }
 0x29e   : > { %v728_v21 = vpop.xlane.xlu1 %727  ;;  %v1237_v22 = vpop.xlane.xlu0 %1236  ;;  %v903_v42 = vsel %vm716_vm8, %v4445_v40, 0.0 }
 0x29f   : > { %3719 = vpow2.f32 %v735_v16  ;;  %v732_v47 = vsub.f32 %v4366_v58, %v728_v21  ;;  %v1247_v25 = vsub.f32 %v4373_v7, %v1237_v22  ;;  %904 = vadd.xlane.f32.xlu0 %v903_v42 }
 0x2a0   : > { %3721 = vpow2.f32 %v737_v17  ;;  %v4474_v17 = vpop.f32.mrb[5].mxu0 }
 0x2a1   : > { %v4451_v54 = vpop.eup %3711  ;;  %v739_v55 = vmul.f32 1.442695, %v732_v47  ;;  %v1251_v26 = vmul.f32 1.442695, %v1247_v25  ;;  %v923_v42 = vmul.f32 %v4108_v19, %v4474_v17  ;;  %v924_v47 = vmul.f32 %v4470_v48, %v4108_v19 }
 0x2a2   : > { %v4453_v27 = vpop.eup %3713  ;;  %v1240_v29 = vpop.xlane.xlu1 %1239  ;;  %v906_v33 = vsel %vm716_vm8, %v4451_v54, 0.0 }
 0x2a3   : > { %v1243_v30 = vpop.xlane.xlu0 %1242  ;;  %3723 = vpow2.f32 %v739_v55  ;;  %v1248_v34 = vsub.f32 %v4380_v18, %v1240_v29  ;;  %907 = vadd.xlane.f32.xlu1 %v906_v33  ;;  %v909_v7 = vsel %vm716_vm8, %v4453_v27, 0.0  ;;  %v3536_v29 = vpack.c.bf16 %v924_v47, %v923_v42 }
 0x2a4   : > { %v1249_v58 = vsub.f32 %v4383_v20, %v1243_v30  ;;  %3725 = vpow2.f32 %v1251_v26  ;;  %910 = vadd.xlane.f32.xlu0 %v909_v7  ;;  %v4488_v26 = vpop.f32.mrb[6].mxu0 }
 0x2a5   : > { %v4461_v35 = vpop.eup %3715  ;;  %v1253_v36 = vmul.f32 1.442695, %v1248_v34  ;;  %v4495_v7 = vpop.f32.mrb[7].mxu0  ;;  %3537 = vmatprep.subr.bf16.mxu0 %v3536_v29 }
 0x2a6   : > { %v1255_v37 = vmul.f32 1.442695, %v1249_v58  ;;  %v4463_v50 = vpop.eup %3717  ;;  %v1246_v41 = vpop.xlane.xlu1 %1245  ;;  %v741_v46 = vsel %vm716_vm8, %v4461_v35, 0.0  ;;  %3539 = vmatpush3.bf16.msra.mxu0 %v3536_v29  ;;  %v762_v29 = vmul.f32 %v4470_v48, %v4052_v3  ;;  %v2596_v12 = vmul.f32 %v4037_v61, %v4495_v7 }
 0x2a7   : > { %3727 = vpow2.f32 %v1253_v36  ;;  %v1250_v18 = vsub.f32 %v4390_v24, %v1246_v41  ;;  %v912_v20 = vsel %vm716_vm8, %v4463_v50, 0.0  ;;  %v925_v41 = vmul.f32 %v4108_v19, %v4495_v7 }
 0x2a8   : > { %3729 = vpow2.f32 %v1255_v37  ;;  %913 = vadd.xlane.f32.xlu1 %v912_v20  ;;  %742 = vadd.xlane.f32.xlu0 %v741_v46  ;;  %v926_v46 = vmul.f32 %v4488_v26, %v4108_v19  ;;  %v761_v19 = vmul.f32 %v4052_v3, %v4474_v17 }
 0x2a9   : > { %v4472_v38 = vpop.eup %3719  ;;  %v1257_v16 = vmul.f32 1.442695, %v1250_v18 }
 0x2aa   : > { %v4476_v21 = vpop.eup %3721  ;;  %v744_v22 = vsel %vm716_vm8, %v4472_v38, 0.0 }
 0x2ab   : > { %3731 = vpow2.f32 %v1257_v16  ;;  %v747_v24 = vsel %vm716_vm8, %v4476_v21, 0.0 }
 0x2ac   : > { %745 = vadd.xlane.f32.xlu1 %v744_v22  ;;  %748 = vadd.xlane.f32.xlu0 %v747_v24  ;;  %v3540_v22 = vpack.c.bf16 %v926_v46, %v925_v41  ;;  %v4526_v41 = vpack.c.bf16 %v762_v29, %v761_v19  ;;  %v1543_v46 = vmul.f32 %v4470_v48, %v4164_v28 }
 0x2ad   : > { %v4486_v25 = vpop.eup %3723  ;;  %v1503_v55 = vpop.xlane.xlu1 %1502 }
 0x2ae   : > { %v4490_v30 = vpop.eup %3725  ;;  %v1511_v33 = vsub.f32 %v4395_v31, %v1503_v55  ;;  %v1500_v34 = vpop.xlane.xlu0 %1499  ;;  %v750_v58 = vsel %vm716_vm8, %v4486_v25, 0.0  ;;  %3541 = vmatprep.subr.bf16.mxu0 %v3540_v22 }
 0x2af   : > { %v1510_v36 = vsub.f32 %v4398_v51, %v1500_v34  ;;  %v1259_v37 = vsel %vm716_vm8, %v4490_v30, 0.0  ;;  %3543 = vmatpush3.bf16.msra.mxu0 %v3540_v22 }
 0x2b0   : > { %v1516_v18 = vmul.f32 1.442695, %v1511_v33  ;;  %751 = vadd.xlane.f32.xlu1 %v750_v58  ;;  %1260 = vadd.xlane.f32.xlu0 %v1259_v37  ;;  %v1280_v58 = vmul.f32 %v4470_v48, %v4135_v23 }
 0x2b1   : > { %v4504_v31 = vpop.eup %3727  ;;  %v1514_v20 = vmul.f32 1.442695, %v1510_v36  ;;  %v1509_v16 = vpop.xlane.xlu1 %1508  ;;  %v1542_v36 = vmul.f32 %v4164_v28, %v4474_v17  ;;  %3545 = vmatprep.subr.bf16.mxu0 %v4526_v41 }
 0x2b2   : > { %v4506_v51 = vpop.eup %3729  ;;  %3733 = vpow2.f32 %v1516_v18  ;;  %v1513_v24 = vsub.f32 %v4405_v44, %v1509_v16  ;;  %v1506_v42 = vpop.xlane.xlu0 %1505  ;;  %v1262_v47 = vsel %vm716_vm8, %v4504_v31, 0.0  ;;  %v1279_v44 = vmul.f32 %v4135_v23, %v4474_v17 }
 0x2b3   : > { %3735 = vpow2.f32 %v1514_v20  ;;  %v1512_v55 = vsub.f32 %v4408_v45, %v1506_v42  ;;  %v1265_v33 = vsel %vm716_vm8, %v4506_v51, 0.0  ;;  %v1805_v18 = vmul.f32 %v4040_v62, %v4474_v17 }
 0x2b4   : > { %v1520_v34 = vmul.f32 1.442695, %v1513_v24  ;;  %1263 = vadd.xlane.f32.xlu1 %v1262_v47  ;;  %1266 = vadd.xlane.f32.xlu0 %v1265_v33  ;;  %v763_v16 = vmul.f32 %v4052_v3, %v4495_v7  ;;  %v764_v24 = vmul.f32 %v4488_v26, %v4052_v3  ;;  %v4539_v22 = vpack.c.bf16 %v1280_v58, %v1279_v44 }
 0x2b5   : > { %v4524_v45 = vpop.eup %3731  ;;  %v1518_v37 = vmul.f32 1.442695, %v1512_v55  ;;  %v1281_v42 = vmul.f32 %v4135_v23, %v4495_v7  ;;  %v1282_v47 = vmul.f32 %v4488_v26, %v4135_v23  ;;  %v4547_v55 = vpack.c.bf16 %v1543_v46, %v1542_v36 }
 0x2b6   : > { %3737 = vpow2.f32 %v1520_v34  ;;  %v1268_v20 = vsel %vm716_vm8, %v4524_v45, 0.0  ;;  %v4545_v19 = vpack.c.bf16 %v764_v24, %v763_v16  ;;  %v1544_v33 = vmul.f32 %v4164_v28, %v4495_v7 }
 0x2b7   : > { %3739 = vpow2.f32 %v1518_v37  ;;  %v1545_v3 = vmul.f32 %v4488_v26, %v4164_v28  ;;  %v4553_v29 = vpack.c.bf16 %v1282_v47, %v1281_v42  ;;  %v1806_v34 = vmul.f32 %v4470_v48, %v4040_v62 }
 0x2b8   : > { %1269 = vadd.xlane.f32.xlu1 %v1268_v20  ;;  %v1807_v44 = vmul.f32 %v4040_v62, %v4495_v7  ;;  %v1808_v23 = vmul.f32 %v4488_v26, %v4040_v62  ;;  %v2068_v36 = vmul.f32 %v4031_v59, %v4474_v17  ;;  %v2069_v37 = vmul.f32 %v4470_v48, %v4031_v59 }
 0x2b9   : > { %v4561_v58 = vpack.c.bf16 %v1545_v3, %v1544_v33  ;;  %v2070_v28 = vmul.f32 %v4031_v59, %v4495_v7  ;;  %v4569_v46 = vpack.c.bf16 %v1806_v34, %v1805_v18  ;;  %v2071_v16 = vmul.f32 %v4488_v26, %v4031_v59 }
 0x2ba   : > { %v4571_v20 = vpack.c.bf16 %v1808_v23, %v1807_v44  ;;  %v2331_v62 = vmul.f32 %v4034_v60, %v4474_v17  ;;  %v4579_v42 = vpack.c.bf16 %v2069_v37, %v2068_v36  ;;  %v2332_v47 = vmul.f32 %v4470_v48, %v4034_v60 }
 0x2bb   : > { %v2333_v33 = vmul.f32 %v4034_v60, %v4495_v7  ;;  %v2334_v18 = vmul.f32 %v4488_v26, %v4034_v60  ;;  %v4591_v34 = vpack.c.bf16 %v2071_v16, %v2070_v28  ;;  %v2594_v44 = vmul.f32 %v4037_v61, %v4474_v17 }
 0x2bc   : > { %v4577_v24 = vpop.eup %3733  ;;  %v2595_v23 = vmul.f32 %v4470_v48, %v4037_v61  ;;  %v4599_v37 = vpack.c.bf16 %v2332_v47, %v2331_v62  ;;  %v2597_v17 = vmul.f32 %v4488_v26, %v4037_v61 }
 0x2bd   : > { %v4587_v3 = vpop.eup %3735  ;;  %v1525_v59 = vsel %vm716_vm8, %v4577_v24, 0.0  ;;  %v4601_v60 = vpack.c.bf16 %v2334_v18, %v2333_v33 }
 0x2be   : > { %1526 = vadd.xlane.f32.xlu1 %v1525_v59  ;;  %v1522_v36 = vsel %vm716_vm8, %v4587_v3, 0.0  ;;  %v4605_v28 = vpack.c.bf16 %v2595_v23, %v2594_v44  ;;  %v4615_v62 = vpack.c.bf16 %v2597_v17, %v2596_v12 }
 0x2bf   : > { %1523 = vadd.xlane.f32.xlu0 %v1522_v36 }
 0x2c0   : > { %v4609_v16 = vpop.eup %3737 }
 0x2c1   : > { %v4611_v48 = vpop.eup %3739  ;;  %v1531_v59 = vsel %vm716_vm8, %v4609_v16, 0.0 }
 0x2c2   : > { %1532 = vadd.xlane.f32.xlu1 %v1531_v59  ;;  %v1528_v47 = vsel %vm716_vm8, %v4611_v48, 0.0 }
 0x2c3   : > { %1529 = vadd.xlane.f32.xlu0 %v1528_v47 }
 0x32c   : > { %v905_v7 = vpop.xlane.xlu0 %904 }
 0x32d   : > { %3741 = vrcp.f32 %v905_v7 }
 0x330   : > { %v908_v33 = vpop.xlane.xlu1 %907 }
 0x331   : > { %3743 = vrcp.f32 %v908_v33  ;;  %v911_v18 = vpop.xlane.xlu0 %910 }
 0x332   : > { %3745 = vrcp.f32 %v911_v18 }
 0x335   : > { %v914_v61 = vpop.xlane.xlu1 %913  ;;  %v743_v26 = vpop.xlane.xlu0 %742 }
 0x336   : > { %3747 = vrcp.f32 %v914_v61 }
 0x337   : > { %v3742_v44 = vpop.eup %3741  ;;  %3749 = vrcp.f32 %v743_v26 }
 0x338   : > { %v919_v23 = vmul.f32 %v3742_v44, %v4445_v40 }
 0x339   : > { %v746_v12 = vpop.xlane.xlu1 %745  ;;  %v749_v36 = vpop.xlane.xlu0 %748 }
 0x33a   : > { %3751 = vrcp.f32 %v746_v12  ;;  %3228 = vmatprep.mubr.msk.f32.mxu0 %vm716_vm8, %v919_v23 }
 0x33b   : > { %v3744_v17 = vpop.eup %3743  ;;  %3753 = vrcp.f32 %v749_v36 }
 0x33c   : > { %v3746_v59 = vpop.eup %3745  ;;  %v920_v47 = vmul.f32 %v3744_v17, %v4451_v54 }
 0x33d   : > { %v752_v7 = vpop.xlane.xlu1 %751  ;;  %v1261_v33 = vpop.xlane.xlu0 %1260  ;;  %v921_v18 = vmul.f32 %v3746_v59, %v4453_v27 }
 0x33e   : > { %3755 = vrcp.f32 %v752_v7  ;;  %3229 = vmatmul.mubr.msk.f32.vlgmr.msra.gmra.mrb[8].mxu0 %vm716_vm8, %v920_v47 }
 0x33f   : > { %3757 = vrcp.f32 %v1261_v33  ;;  %3547 = vmatpush3.bf16.msra.mxu0 %v4526_v41  ;;  %3231 = vmatprep.mubr.msk.f32.mxu0 %vm716_vm8, %v921_v18 }
 0x340   : > { %v3748_v40 = vpop.eup %3747  ;;  %3549 = vmatprep.subr.bf16.mxu0 %v4545_v19 }
 0x341   : > { %v3750_v61 = vpop.eup %3749  ;;  %v1264_v26 = vpop.xlane.xlu1 %1263  ;;  %v922_v54 = vmul.f32 %v3748_v40, %v4463_v50 }
 0x342   : > { %v1267_v44 = vpop.xlane.xlu0 %1266  ;;  %3759 = vrcp.f32 %v1264_v26  ;;  %v757_v23 = vmul.f32 %v3750_v61, %v4461_v35 }
 0x343   : > { %3761 = vrcp.f32 %v1267_v44  ;;  %3232 = vmatmul.mubr.msk.f32.gmra.mrb[10].mxu0 %vm716_vm8, %v922_v54 }
 0x344   : > { %v3752_v27 = vpop.eup %3751  ;;  %3551 = vmatpush3.bf16.msra.mxu0 %v4545_v19  ;;  %3242 = vmatprep.mubr.msk.f32.mxu0 %vm716_vm8, %v757_v23 }
 0x345   : > { %v3754_v41 = vpop.eup %3753  ;;  %v758_v12 = vmul.f32 %v3752_v27, %v4472_v38  ;;  %3565 = vmatprep.subr.bf16.mxu0 %v4539_v22  ;;  %v1270_v36 = vpop.xlane.xlu1 %1269 }
 0x346   : > { %3763 = vrcp.f32 %v1270_v36  ;;  %v759_v50 = vmul.f32 %v3754_v41, %v4476_v21 }
 0x347   : > { %3243 = vmatmul.mubr.msk.f32.vlgmr.msra.gmra.mrb[8].mxu0 %vm716_vm8, %v758_v12 }
 0x348   : > { %v3756_v35 = vpop.eup %3755  ;;  %3567 = vmatpush3.bf16.msra.mxu0 %v4539_v22  ;;  %3245 = vmatprep.mubr.msk.f32.mxu0 %vm716_vm8, %v759_v50  ;;  %v2280_v50 = vmul.f32 0.25, %v4422_v63 }
 0x349   : > { %v3758_v17 = vpop.eup %3757  ;;  %3569 = vmatprep.subr.bf16.mxu0 %v4553_v29  ;;  %v760_v19 = vmul.f32 %v3756_v35, %v4486_v25 }
 0x34a   : > { %v1275_v38 = vmul.f32 %v3758_v17, %v4490_v30  ;;  %v2279_v17 = vmul.f32 0.25, %v4424_v0 }
 0x34b   : > { %3246 = vmatmul.mubr.msk.f32.gmra.mrb[10].mxu0 %vm716_vm8, %v760_v19  ;;  %v1527_v59 = vpop.xlane.xlu1 %1526 }
 0x34c   : > { %v3760_v47 = vpop.eup %3759  ;;  %3571 = vmatpush3.bf16.msra.mxu0 %v4553_v29  ;;  %3765 = vrcp.f32 %v1527_v59  ;;  %3270 = vmatprep.mubr.msk.f32.mxu0 %vm716_vm8, %v1275_v38  ;;  %v1524_v21 = vpop.xlane.xlu0 %1523  ;;  %v2282_v38 = vmul.f32 0.25, %v4426_v4  ;;  %v4733_v59 = vadd.f32 %v2280_v50, %v4325_v53 }
 0x34d   : > { %v3762_v22 = vpop.eup %3761  ;;  %v1276_v7 = vmul.f32 %v3760_v47, %v4504_v31  ;;  %3585 = vmatprep.subr.bf16.mxu0 %v4547_v55  ;;  %3767 = vrcp.f32 %v1524_v21  ;;  %v2281_v47 = vmul.f32 0.25, %v4428_v5  ;;  %v4739_v21 = vadd.f32 %v2279_v17, %v4317_v32 }
 0x34e   : > { %v1277_v25 = vmul.f32 %v3762_v22, %v4506_v51  ;;  %v2543_v22 = vmul.f32 0.25, %v4430_v6  ;;  %v2290_v4 = vsel %vm716_vm8, %v4733_v59, -inf }
 0x34f   : > { %3271 = vmatmul.mubr.msk.f32.vlgmr.msra.gmra.mrb[8].mxu0 %vm716_vm8, %v1276_v7  ;;  %v1533_v30 = vpop.xlane.xlu1 %1532  ;;  %v4745_v7 = vadd.f32 %v2282_v38, %v4346_v43  ;;  %v2287_v5 = vsel %vm716_vm8, %v4739_v21, -inf }
 0x350   : > { %v3764_v33 = vpop.eup %3763  ;;  %3587 = vmatpush3.bf16.msra.mxu0 %v4547_v55  ;;  %3769 = vrcp.f32 %v1533_v30  ;;  %3273 = vmatprep.mubr.msk.f32.mxu0 %vm716_vm8, %v1277_v25  ;;  %v1530_v29 = vpop.xlane.xlu0 %1529  ;;  %v2542_v25 = vmul.f32 0.25, %v4432_v8  ;;  %v4751_v30 = vadd.f32 %v2281_v47, %v4335_v39 }
 0x351   : > { %3589 = vmatprep.subr.bf16.mxu0 %v4561_v58  ;;  %3771 = vrcp.f32 %v1530_v29  ;;  %v1278_v31 = vmul.f32 %v3764_v33, %v4524_v45  ;;  %v2545_v33 = vmul.f32 0.25, %v4434_v10  ;;  %v2296_v6 = vsel %vm716_vm8, %v4745_v7, -inf }
 0x352   : > { %v4757_v29 = vadd.f32 %v2543_v22, %v4325_v53  ;;  %v2293_v8 = vsel %vm716_vm8, %v4751_v30, -inf }
 0x353   : > { %3274 = vmatmul.mubr.msk.f32.gmra.mrb[10].mxu0 %vm716_vm8, %v1278_v31  ;;  %v4923_v31 = vld [vmem:[#allocation2_spill] sm:$0xff]  ;;  %v4768_v10 = vadd.f32 %v2545_v33, %v4346_v43 }
 0x354   : > { %3591 = vmatpush3.bf16.msra.mxu0 %v4561_v58 }
 0x355   : > { %3594 = vmatprep.subr.msk.bf16.mxu0 %vm4045_vm14, %v4049_v2 }
 0x356   : > { %v3766_v51 = vpop.eup %3765 }
 0x357   : > { %v3768_v18 = vpop.eup %3767  ;;  %v1539_v40 = vmul.f32 %v3766_v51, %v4577_v24  ;;  %v2544_v51 = vmul.f32 0.25, %v4923_v31 }
 0x358   : > { %v1538_v55 = vmul.f32 %v3768_v18, %v4587_v3  ;;  %v4763_v18 = vadd.f32 %v2542_v25, %v4317_v32 }
 0x35a   : > { %v3770_v61 = vpop.eup %3769  ;;  %3298 = vmatprep.mubr.msk.f32.mxu0 %vm716_vm8, %v1538_v55  ;;  %v2553_v55 = vsel %vm716_vm8, %v4757_v29, -inf }
 0x35b   : > { %v3772_v26 = vpop.eup %3771  ;;  %3299 = vmatmul.mubr.msk.f32.vlgmr.msra.gmra.mrb[8].mxu0 %vm716_vm8, %v1539_v40  ;;  %v1541_v58 = vmul.f32 %v3770_v61, %v4609_v16  ;;  %v4771_v40 = vadd.f32 %v2544_v51, %v4335_v39  ;;  %v2559_v61 = vsel %vm716_vm8, %v4768_v10, -inf }
 0x35c   : > { %v1540_v45 = vmul.f32 %v3772_v26, %v4611_v48 }
 0x35d   : > { %3597 = vmatpush3.bf16.xpose.msk.msra.mxu0 %vm4045_vm14, %v4049_v2 }
 0x35e   : > { %3600 = vmatprep.subr.msk.bf16.mxu0 %vm4045_vm14, %v4066_v9  ;;  %3301 = vmatprep.mubr.msk.f32.mxu0 %vm716_vm8, %v1540_v45 }
 0x35f   : > { %3302 = vmatmul.mubr.msk.f32.gmra.mrb[10].mxu0 %vm716_vm8, %v1541_v58 }
 0x360   : > { %3312 = vmatprep.mubr.msk.f32.mxu0 %vm598_vm12, %v4073_v11 }
 0x365   : > { %3603 = vmatpush3.bf16.xpose.msk.msra.mxu0 %vm4045_vm14, %v4066_v9 }
 0x366   : > { %3605 = vmatprep.subr.bf16.mxu0 %v4569_v46 }
 0x36c   : > { %3313 = vmatmul.mubr.msk.f32.vlgmr.msra.gmra.mrb[12].mxu0 %vm598_vm12, %v4082_v13 }
 0x36d   : > { %3315 = vmatprep.mubr.msk.f32.mxu0 %vm598_vm12, %v4086_v14  ;;  %3607 = vmatpush3.bf16.msra.mxu0 %v4569_v46  ;;  %v2017_v46 = vmul.f32 0.25, %v4414_v49  ;;  %v2019_v49 = vmul.f32 0.25, %v4418_v56 }
 0x36e   : > { %3609 = vmatprep.subr.bf16.mxu0 %v4571_v20 }
 0x36f   : > { %v4709_v41 = vadd.f32 %v2017_v46, %v4325_v53  ;;  %v4721_v35 = vadd.f32 %v2019_v49, %v4346_v43 }
 0x370   : > { %3316 = vmatmul.mubr.msk.f32.gmra.mrb[14].mxu0 %vm598_vm12, %v4090_v15 }
 0x371   : > { %3611 = vmatpush3.bf16.msra.mxu0 %v4571_v20  ;;  %v2016_v20 = vmul.f32 0.25, %v4416_v52  ;;  %v2018_v52 = vmul.f32 0.25, %v4420_v57  ;;  %v2027_v56 = vsel %vm716_vm8, %v4709_v41, -inf  ;;  %v2033_v63 = vsel %vm716_vm8, %v4721_v35, -inf }
 0x372   : > { %3625 = vmatprep.subr.bf16.mxu0 %v4579_v42 }
 0x373   : > { %v4715_v36 = vadd.f32 %v2016_v20, %v4317_v32  ;;  %v4727_v19 = vadd.f32 %v2018_v52, %v4335_v39 }
 0x375   : > { %v2024_v57 = vsel %vm716_vm8, %v4715_v36, -inf  ;;  %v2030_v0 = vsel %vm716_vm8, %v4727_v19, -inf }
 0x43f   : > { %v3314_v1 = vpop.f32.mrb[12].mxu0 }
 0x440   : > { %v1754_v2 = vmul.f32 0.25, %v3314_v1  ;;  %v1734_v9 = vpop.f32.mrb[13].mxu0 }
 0x441   : > { %v1753_v11 = vmul.f32 0.25, %v1734_v9 }
 0x442   : > { %v4688_v13 = vadd.f32 %v1754_v2, %v4325_v53  ;;  %v2550_v53 = vsel %vm716_vm8, %v4763_v18, -inf }
 0x443   : > { %v3317_v24 = vpop.f32.mrb[14].mxu0  ;;  %v4691_v14 = vadd.f32 %v1753_v11, %v4317_v32  ;;  %v2556_v32 = vsel %vm716_vm8, %v4771_v40, -inf }
 0x444   : > { %v1756_v3 = vmul.f32 0.25, %v3317_v24  ;;  %v1744_v16 = vpop.f32.mrb[15].mxu0  ;;  %v1764_v15 = vsel %vm716_vm8, %v4688_v13, -inf }
 0x445   : > { %v1755_v48 = vmul.f32 0.25, %v1744_v16  ;;  %1765 = vmax.xlane.f32.xlu1 %v1764_v15  ;;  %v1761_v44 = vsel %vm716_vm8, %v4691_v14, -inf }
 0x446   : > { %1762 = vmax.xlane.f32.xlu0 %v1761_v44  ;;  %v4700_v54 = vadd.f32 %v1756_v3, %v4346_v43 }
 0x447   : > { %v4703_v23 = vadd.f32 %v1755_v48, %v4335_v39 }
 0x448   : > { %v1770_v27 = vsel %vm716_vm8, %v4700_v54, -inf }
 0x449   : > { %1771 = vmax.xlane.f32.xlu1 %v1770_v27  ;;  %v1767_v12 = vsel %vm716_vm8, %v4703_v23, -inf }
 0x44a   : > { %1768 = vmax.xlane.f32.xlu0 %v1767_v12 }
 0x44d   : > { %2028 = vmax.xlane.f32.xlu1 %v2027_v56 }
 0x44e   : > { %2025 = vmax.xlane.f32.xlu0 %v2024_v57 }
 0x451   : > { %2034 = vmax.xlane.f32.xlu1 %v2033_v63 }
 0x452   : > { %2031 = vmax.xlane.f32.xlu0 %v2030_v0 }
 0x455   : > { %2291 = vmax.xlane.f32.xlu1 %v2290_v4 }
 0x456   : > { %2288 = vmax.xlane.f32.xlu0 %v2287_v5 }
 0x459   : > { %2297 = vmax.xlane.f32.xlu1 %v2296_v6 }
 0x45a   : > { %2294 = vmax.xlane.f32.xlu0 %v2293_v8 }
 0x45d   : > { %2554 = vmax.xlane.f32.xlu1 %v2553_v55 }
 0x45e   : > { %2551 = vmax.xlane.f32.xlu0 %v2550_v53 }
 0x461   : > { %2560 = vmax.xlane.f32.xlu1 %v2559_v61 }
 0x462   : > { %2557 = vmax.xlane.f32.xlu0 %v2556_v32 }
 0x4d2   : > { %v1766_v26 = vpop.xlane.xlu1 %1765 }
 0x4d3   : > { %v1774_v43 = vsub.f32 %v4688_v13, %v1766_v26  ;;  %v1763_v45 = vpop.xlane.xlu0 %1762 }
 0x4d4   : > { %v1773_v39 = vsub.f32 %v4691_v14, %v1763_v45 }
 0x4d5   : > { %v1779_v58 = vmul.f32 1.442695, %v1774_v43 }
 0x4d6   : > { %v1777_v1 = vmul.f32 1.442695, %v1773_v39  ;;  %v1772_v2 = vpop.xlane.xlu1 %1771 }
 0x4d7   : > { %3773 = vpow2.f32 %v1779_v58  ;;  %v1776_v9 = vsub.f32 %v4700_v54, %v1772_v2  ;;  %v1769_v11 = vpop.xlane.xlu0 %1768 }
 0x4d8   : > { %3775 = vpow2.f32 %v1777_v1  ;;  %v1775_v24 = vsub.f32 %v4703_v23, %v1769_v11 }
 0x4d9   : > { %v1783_v46 = vmul.f32 1.442695, %v1776_v9 }
 0x4da   : > { %v1781_v3 = vmul.f32 1.442695, %v1775_v24  ;;  %v2029_v16 = vpop.xlane.xlu1 %2028 }
 0x4db   : > { %3777 = vpow2.f32 %v1783_v46  ;;  %v2037_v15 = vsub.f32 %v4709_v41, %v2029_v16  ;;  %v2026_v13 = vpop.xlane.xlu0 %2025 }
 0x4dc   : > { %3779 = vpow2.f32 %v1781_v3  ;;  %v2036_v14 = vsub.f32 %v4715_v36, %v2026_v13 }
 0x4dd   : > { %v2042_v20 = vmul.f32 1.442695, %v2037_v15 }
 0x4de   : > { %v2040_v48 = vmul.f32 1.442695, %v2036_v14  ;;  %v2035_v44 = vpop.xlane.xlu1 %2034 }
 0x4df   : > { %3781 = vpow2.f32 %v2042_v20  ;;  %v2039_v54 = vsub.f32 %v4721_v35, %v2035_v44  ;;  %v2032_v49 = vpop.xlane.xlu0 %2031 }
 0x4e0   : > { %3783 = vpow2.f32 %v2040_v48  ;;  %v2038_v23 = vsub.f32 %v4727_v19, %v2032_v49 }
 0x4e1   : > { %v4787_v27 = vpop.eup %3773  ;;  %v2046_v52 = vmul.f32 1.442695, %v2039_v54 }
 0x4e2   : > { %v4789_v12 = vpop.eup %3775  ;;  %v2044_v41 = vmul.f32 1.442695, %v2038_v23  ;;  %v2292_v50 = vpop.xlane.xlu1 %2291  ;;  %v1788_v36 = vsel %vm716_vm8, %v4787_v27, 0.0 }
 0x4e3   : > { %3785 = vpow2.f32 %v2046_v52  ;;  %v2300_v56 = vsub.f32 %v4733_v59, %v2292_v50  ;;  %1789 = vadd.xlane.f32.xlu1 %v1788_v36  ;;  %v2289_v17 = vpop.xlane.xlu0 %2288  ;;  %v1785_v35 = vsel %vm716_vm8, %v4789_v12, 0.0 }
 0x4e4   : > { %3787 = vpow2.f32 %v2044_v41  ;;  %v2299_v57 = vsub.f32 %v4739_v21, %v2289_v17  ;;  %1786 = vadd.xlane.f32.xlu0 %v1785_v35 }
 0x4e5   : > { %v4797_v19 = vpop.eup %3777  ;;  %v2305_v38 = vmul.f32 1.442695, %v2300_v56 }
 0x4e6   : > { %v4799_v63 = vpop.eup %3779  ;;  %v2303_v47 = vmul.f32 1.442695, %v2299_v57  ;;  %v2298_v0 = vpop.xlane.xlu1 %2297  ;;  %v1794_v22 = vsel %vm716_vm8, %v4797_v19, 0.0 }
 0x4e7   : > { %3789 = vpow2.f32 %v2305_v38  ;;  %v2302_v59 = vsub.f32 %v4745_v7, %v2298_v0  ;;  %1795 = vadd.xlane.f32.xlu1 %v1794_v22  ;;  %v2295_v4 = vpop.xlane.xlu0 %2294  ;;  %v1791_v25 = vsel %vm716_vm8, %v4799_v63, 0.0 }
 0x4e8   : > { %3791 = vpow2.f32 %v2303_v47  ;;  %v2301_v21 = vsub.f32 %v4751_v30, %v2295_v4  ;;  %1792 = vadd.xlane.f32.xlu0 %v1791_v25 }
 0x4e9   : > { %v4807_v5 = vpop.eup %3781  ;;  %v2309_v33 = vmul.f32 1.442695, %v2302_v59 }
 0x4ea   : > { %v4809_v6 = vpop.eup %3783  ;;  %v2307_v31 = vmul.f32 1.442695, %v2301_v21  ;;  %v2555_v51 = vpop.xlane.xlu1 %2554  ;;  %v2051_v8 = vsel %vm716_vm8, %v4807_v5, 0.0 }
 0x4eb   : > { %3793 = vpow2.f32 %v2309_v33  ;;  %v2563_v7 = vsub.f32 %v4757_v29, %v2555_v51  ;;  %2052 = vadd.xlane.f32.xlu1 %v2051_v8  ;;  %v2552_v55 = vpop.xlane.xlu0 %2551  ;;  %v2048_v53 = vsel %vm716_vm8, %v4809_v6, 0.0 }
 0x4ec   : > { %3795 = vpow2.f32 %v2307_v31  ;;  %v2562_v30 = vsub.f32 %v4763_v18, %v2552_v55  ;;  %2049 = vadd.xlane.f32.xlu0 %v2048_v53 }
 0x4ed   : > { %v4817_v61 = vpop.eup %3785  ;;  %v2568_v32 = vmul.f32 1.442695, %v2563_v7 }
 0x4ee   : > { %v4819_v26 = vpop.eup %3787  ;;  %v2566_v43 = vmul.f32 1.442695, %v2562_v30  ;;  %v2561_v45 = vpop.xlane.xlu1 %2560  ;;  %v2057_v39 = vsel %vm716_vm8, %v4817_v61, 0.0 }
 0x4ef   : > { %3797 = vpow2.f32 %v2568_v32  ;;  %v2565_v29 = vsub.f32 %v4768_v10, %v2561_v45  ;;  %2058 = vadd.xlane.f32.xlu1 %v2057_v39  ;;  %v2558_v58 = vpop.xlane.xlu0 %2557  ;;  %v2054_v1 = vsel %vm716_vm8, %v4819_v26, 0.0 }
 0x4f0   : > { %3799 = vpow2.f32 %v2566_v43  ;;  %v2564_v18 = vsub.f32 %v4771_v40, %v2558_v58  ;;  %2055 = vadd.xlane.f32.xlu0 %v2054_v1 }
 0x4f1   : > { %v4827_v2 = vpop.eup %3789  ;;  %v2572_v9 = vmul.f32 1.442695, %v2565_v29 }
 0x4f2   : > { %v4829_v11 = vpop.eup %3791  ;;  %v2570_v24 = vmul.f32 1.442695, %v2564_v18  ;;  %v2314_v46 = vsel %vm716_vm8, %v4827_v2, 0.0 }
 0x4f3   : > { %3801 = vpow2.f32 %v2572_v9  ;;  %2315 = vadd.xlane.f32.xlu1 %v2314_v46  ;;  %v2311_v10 = vsel %vm716_vm8, %v4829_v11, 0.0 }
 0x4f4   : > { %3803 = vpow2.f32 %v2570_v24  ;;  %2312 = vadd.xlane.f32.xlu0 %v2311_v10 }
 0x4f5   : > { %v4835_v3 = vpop.eup %3793 }
 0x4f6   : > { %v4837_v40 = vpop.eup %3795  ;;  %v2320_v16 = vsel %vm716_vm8, %v4835_v3, 0.0 }
 0x4f7   : > { %2321 = vadd.xlane.f32.xlu1 %v2320_v16  ;;  %v2317_v15 = vsel %vm716_vm8, %v4837_v40, 0.0 }
 0x4f8   : > { %2318 = vadd.xlane.f32.xlu0 %v2317_v15 }
 0x4f9   : > { %v4843_v13 = vpop.eup %3797 }
 0x4fa   : > { %v4845_v14 = vpop.eup %3799  ;;  %v2577_v20 = vsel %vm716_vm8, %v4843_v13, 0.0 }
 0x4fb   : > { %2578 = vadd.xlane.f32.xlu1 %v2577_v20  ;;  %v2574_v48 = vsel %vm716_vm8, %v4845_v14, 0.0 }
 0x4fc   : > { %2575 = vadd.xlane.f32.xlu0 %v2574_v48 }
 0x4fd   : > { %v4851_v44 = vpop.eup %3801 }
 0x4fe   : > { %v4853_v54 = vpop.eup %3803  ;;  %v2583_v49 = vsel %vm716_vm8, %v4851_v44, 0.0 }
 0x4ff   : > { %2584 = vadd.xlane.f32.xlu1 %v2583_v49  ;;  %v2580_v23 = vsel %vm716_vm8, %v4853_v54, 0.0 }
 0x500   : > { %2581 = vadd.xlane.f32.xlu0 %v2580_v23 }
 0x570   : > { %v1790_v52 = vpop.xlane.xlu1 %1789 }
 0x571   : > { %3805 = vrcp.f32 %v1790_v52  ;;  %v1787_v41 = vpop.xlane.xlu0 %1786 }
 0x572   : > { %3807 = vrcp.f32 %v1787_v41 }
 0x574   : > { %v1796_v50 = vpop.xlane.xlu1 %1795 }
 0x575   : > { %3809 = vrcp.f32 %v1796_v50  ;;  %v1793_v36 = vpop.xlane.xlu0 %1792 }
 0x576   : > { %3811 = vrcp.f32 %v1793_v36 }
 0x578   : > { %v2053_v56 = vpop.xlane.xlu1 %2052 }
 0x579   : > { %3813 = vrcp.f32 %v2053_v56  ;;  %v2050_v17 = vpop.xlane.xlu0 %2049 }
 0x57a   : > { %3815 = vrcp.f32 %v2050_v17 }
 0x57b   : > { %v3806_v35 = vpop.eup %3805 }
 0x57c   : > { %v3808_v57 = vpop.eup %3807  ;;  %v2059_v38 = vpop.xlane.xlu1 %2058  ;;  %v1802_v22 = vmul.f32 %v3806_v35, %v4787_v27 }
 0x57d   : > { %3817 = vrcp.f32 %v2059_v38  ;;  %v2056_v47 = vpop.xlane.xlu0 %2055  ;;  %v1801_v0 = vmul.f32 %v3808_v57, %v4789_v12 }
 0x57e   : > { %3819 = vrcp.f32 %v2056_v47 }
 0x57f   : > { %v3810_v59 = vpop.eup %3809  ;;  %3326 = vmatprep.mubr.msk.f32.mxu0 %vm716_vm8, %v1801_v0 }
 0x580   : > { %v3812_v4 = vpop.eup %3811  ;;  %v2316_v25 = vpop.xlane.xlu1 %2315  ;;  %3327 = vmatmul.mubr.msk.f32.vlgmr.msra.gmra.mrb[8].mxu0 %vm716_vm8, %v1802_v22  ;;  %v1804_v12 = vmul.f32 %v3810_v59, %v4797_v19 }
 0x581   : > { %3821 = vrcp.f32 %v2316_v25  ;;  %3627 = vmatpush3.bf16.msra.mxu0 %v4579_v42  ;;  %v2313_v21 = vpop.xlane.xlu0 %2312  ;;  %v1803_v33 = vmul.f32 %v3812_v4, %v4799_v63 }
 0x582   : > { %3629 = vmatprep.subr.bf16.mxu0 %v4591_v34  ;;  %3823 = vrcp.f32 %v2313_v21 }
 0x583   : > { %v3814_v27 = vpop.eup %3813  ;;  %3329 = vmatprep.mubr.msk.f32.mxu0 %vm716_vm8, %v1803_v33 }
 0x584   : > { %v3816_v31 = vpop.eup %3815  ;;  %v2322_v51 = vpop.xlane.xlu1 %2321  ;;  %3330 = vmatmul.mubr.msk.f32.gmra.mrb[10].mxu0 %vm716_vm8, %v1804_v12  ;;  %v2065_v63 = vmul.f32 %v3814_v27, %v4807_v5 }
 0x585   : > { %3825 = vrcp.f32 %v2322_v51  ;;  %3631 = vmatpush3.bf16.msra.mxu0 %v4591_v34  ;;  %v2319_v8 = vpop.xlane.xlu0 %2318  ;;  %v2064_v42 = vmul.f32 %v3816_v31, %v4809_v6 }
 0x586   : > { %3645 = vmatprep.subr.bf16.mxu0 %v4599_v37  ;;  %3827 = vrcp.f32 %v2319_v8 }
 0x587   : > { %v3818_v7 = vpop.eup %3817  ;;  %3354 = vmatprep.mubr.msk.f32.mxu0 %vm716_vm8, %v2064_v42 }
 0x588   : > { %v3820_v19 = vpop.eup %3819  ;;  %v2579_v55 = vpop.xlane.xlu1 %2578  ;;  %3355 = vmatmul.mubr.msk.f32.vlgmr.msra.gmra.mrb[8].mxu0 %vm716_vm8, %v2065_v63  ;;  %v2067_v5 = vmul.f32 %v3818_v7, %v4817_v61 }
 0x589   : > { %3829 = vrcp.f32 %v2579_v55  ;;  %3647 = vmatpush3.bf16.msra.mxu0 %v4599_v37  ;;  %v2576_v53 = vpop.xlane.xlu0 %2575  ;;  %v2066_v34 = vmul.f32 %v3820_v19, %v4819_v26 }
 0x58a   : > { %3649 = vmatprep.subr.bf16.mxu0 %v4601_v60  ;;  %3831 = vrcp.f32 %v2576_v53 }
 0x58b   : > { %v3822_v6 = vpop.eup %3821  ;;  %3357 = vmatprep.mubr.msk.f32.mxu0 %vm716_vm8, %v2066_v34 }
 0x58c   : > { %v3824_v30 = vpop.eup %3823  ;;  %v2585_v32 = vpop.xlane.xlu1 %2584  ;;  %3358 = vmatmul.mubr.msk.f32.gmra.mrb[10].mxu0 %vm716_vm8, %v2067_v5  ;;  %v2328_v26 = vmul.f32 %v3822_v6, %v4827_v2 }
 0x58d   : > { %3833 = vrcp.f32 %v2585_v32  ;;  %3651 = vmatpush3.bf16.msra.mxu0 %v4601_v60  ;;  %v2582_v43 = vpop.xlane.xlu0 %2581  ;;  %v2327_v37 = vmul.f32 %v3824_v30, %v4829_v11 }
 0x58e   : > { %3665 = vmatprep.subr.bf16.mxu0 %v4605_v28  ;;  %3835 = vrcp.f32 %v2582_v43 }
 0x58f   : > { %v3826_v45 = vpop.eup %3825  ;;  %3382 = vmatprep.mubr.msk.f32.mxu0 %vm716_vm8, %v2327_v37 }
 0x590   : > { %v3828_v61 = vpop.eup %3827  ;;  %3383 = vmatmul.mubr.msk.f32.vlgmr.msra.gmra.mrb[8].mxu0 %vm716_vm8, %v2328_v26  ;;  %v2330_v60 = vmul.f32 %v3826_v45, %v4835_v3 }
 0x591   : > { %3667 = vmatpush3.bf16.msra.mxu0 %v4605_v28  ;;  %v2329_v39 = vmul.f32 %v3828_v61, %v4837_v40 }
 0x592   : > { %3669 = vmatprep.subr.bf16.mxu0 %v4615_v62 }
 0x593   : > { %v3830_v29 = vpop.eup %3829  ;;  %3385 = vmatprep.mubr.msk.f32.mxu0 %vm716_vm8, %v2329_v39 }
 0x594   : > { %v3832_v58 = vpop.eup %3831  ;;  %3386 = vmatmul.mubr.msk.f32.gmra.mrb[10].mxu0 %vm716_vm8, %v2330_v60  ;;  %v2591_v18 = vmul.f32 %v3830_v29, %v4843_v13 }
 0x595   : > { %3671 = vmatpush3.bf16.msra.mxu0 %v4615_v62  ;;  %v2590_v1 = vmul.f32 %v3832_v58, %v4845_v14 }
 0x597   : > { %v3834_v28 = vpop.eup %3833  ;;  %3410 = vmatprep.mubr.msk.f32.mxu0 %vm716_vm8, %v2590_v1 }
 0x598   : > { %v3836_v2 = vpop.eup %3835  ;;  %3411 = vmatmul.mubr.msk.f32.vlgmr.msra.gmra.mrb[8].mxu0 %vm716_vm8, %v2591_v18  ;;  %v2593_v11 = vmul.f32 %v3834_v28, %v4851_v44 }
 0x599   : > { %v2592_v9 = vmul.f32 %v3836_v2, %v4853_v54 }
 0x59b   : > { %3413 = vmatprep.mubr.msk.f32.mxu0 %vm716_vm8, %v2592_v9 }
 0x59c   : > { %3414 = vmatmul.mubr.msk.f32.gmra.mrb[10].mxu0 %vm716_vm8, %v2593_v11 }
 0x66b   : > { %v3412_v62 = vpop.f32.mrb[8].mxu0 }
 0x66c   : > { %2700 = vst.msk [vmem:[%s271_s22 + $0x8] sm:$0xff] %vm598_vm12, %v3412_v62  ;;  %v2676_v24 = vpop.f32.mrb[9].mxu0 }
 0x66d   : > { %2699 = vst.msk [vmem:[%s271_s22] sm:$0xff] %vm598_vm12, %v2676_v24 }
 0x66f   : > { %v3415_v46 = vpop.f32.mrb[10].mxu0 }
 0x670   : > { %2702 = vst.msk [vmem:[%s271_s22 + $0x18] sm:$0xff] %vm598_vm12, %v3415_v46  ;;  %v2686_v10 = vpop.f32.mrb[11].mxu0 }
 0x671   : > { %2701 = vst.msk [vmem:[%s271_s22 + $0x10] sm:$0xff] %vm598_vm12, %v2686_v10 }
 0x672 PF: > { %s16_s21 = sadd.s32 1, %s3843_s21  }
 0x673   : > { %p13_p4 = scmp.ge.s32.totalorder %s16_s21, 4  }
 0x675   :  { %15 = sbr.rel (!%p13_p4) target bundleno = 1 (0x1), region = 77 }

</bundles_post_ra>
